<compile_context>
chip_gen: v5e
topology: v5e:2x2
jax: 0.10.0
libtpu: 0.0.40
codegen_flags: <defaults>
</compile_context>

<pallas_src>
import functools

import jax
import jax.numpy as jnp
from jax.experimental import pallas as pl
from jax.experimental.pallas import tpu as pltpu

_BN_EPS = 1e-5


# --------------------------------------------------------------------------------------
# Pallas kernel: fused GEMM + bias + ReLU + folded-BatchNorm affine epilogue.
# --------------------------------------------------------------------------------------
def _gemm_bias_relu_bn_kernel(x_ref, w_ref, b_ref, s_ref, t_ref, o_ref):
    # x_ref: [TILE_R, K_pad]   w_ref: [K_pad, N_pad]
    # b_ref/s_ref/t_ref: [1, N_pad]  (bias, bn_scale, bn_shift)   o_ref: [TILE_R, N_pad]
    acc = jnp.dot(x_ref[...], w_ref[...], preferred_element_type=jnp.float32)
    acc = acc + b_ref[...]              # bias add in f32 (on the accumulator)
    acc = jnp.maximum(acc, 0.0)         # ReLU (f32)
    acc = acc * s_ref[...] + t_ref[...]  # BatchNorm2d (eval) folded to per-channel affine
    o_ref[...] = acc.astype(o_ref.dtype)


# --------------------------------------------------------------------------------------
# Wrapper helpers (layout plumbing only — all FLOPs happen in the kernel).
# --------------------------------------------------------------------------------------
def _round_up(x, m):
    return ((x + m - 1) // m) * m


def _pad2d(a, rows, cols):
    return jnp.pad(a, ((0, rows - a.shape[0]), (0, cols - a.shape[1])))


def _im2col(x_nhwc, ksize, stride, padding):
    """[B,H,W,C] -> ([B*Ho*Wo, k*k*C], (B, Ho, Wo)); column order = (kh, kw, c)."""
    b, h, w, c = x_nhwc.shape
    xp = jnp.pad(x_nhwc, ((0, 0), (padding, padding), (padding, padding), (0, 0)))
    ho = (h + 2 * padding - ksize) // stride + 1
    wo = (w + 2 * padding - ksize) // stride + 1
    cols = []
    for kh in range(ksize):
        for kw in range(ksize):
            cols.append(xp[:, kh:kh + stride * ho:stride, kw:kw + stride * wo:stride, :])
    patches = jnp.concatenate(cols, axis=-1)                 # [B, Ho, Wo, k*k*C]
    return patches.reshape(b * ho * wo, ksize * ksize * c), (b, ho, wo)


def _conv_relu_bn_layer(x_nhwc, lp, *, ksize, stride, padding,
                        compute_dtype=jnp.float32):
    """One fused Conv2d + ReLU + BatchNorm2d(eval) layer via a Pallas GEMM kernel."""
    w, b = lp["w"], lp["b"]                                  # w: [C_out, C_in, k, k]
    c_out = w.shape[0]

    x_col, (bsz, ho, wo) = _im2col(x_nhwc, ksize, stride, padding)
    rows, k = x_col.shape

    # Pad to MXU/lane-friendly shapes (sliced off after the call).
    k_pad = _round_up(k, 128)
    n_pad = _round_up(c_out, 128)
    tile_r = min(256, _round_up(rows, 8))
    r_pad = _round_up(rows, tile_r)

    # Weight as [k*k*C_in, C_out] with (kh, kw, c) ordering to match _im2col.
    w_mat = jnp.transpose(w, (2, 3, 1, 0)).reshape(k, c_out)
    # Fold BatchNorm2d (eval mode) into scale/shift applied after the activation.
    # TODO(synk): training-mode BatchNorm (batch statistics) would need a cross-tile
    # reduction pass; eval-mode running stats are used here.
    scale = lp["gamma"] / jnp.sqrt(lp["var"] + _BN_EPS)
    shift = lp["beta"] - lp["mean"] * scale

    x_p = _pad2d(x_col, r_pad, k_pad).astype(compute_dtype)
    w_p = _pad2d(w_mat, k_pad, n_pad).astype(compute_dtype)
    b_p = _pad2d(b.reshape(1, c_out).astype(jnp.float32), 1, n_pad)
    s_p = _pad2d(scale.reshape(1, c_out).astype(jnp.float32), 1, n_pad)
    t_p = _pad2d(shift.reshape(1, c_out).astype(jnp.float32), 1, n_pad)

    grid = (r_pad // tile_r,)
    cost = pl.CostEstimate(
        flops=2 * r_pad * k_pad * n_pad,
        transcendentals=0,
        bytes_accessed=4 * (r_pad * k_pad + k_pad * n_pad + r_pad * n_pad + 3 * n_pad),
    )

    out = pl.pallas_call(
        _gemm_bias_relu_bn_kernel,
        out_shape=jax.ShapeDtypeStruct((r_pad, n_pad), jnp.float32),
        grid=grid,
        in_specs=[
            pl.BlockSpec((tile_r, k_pad), lambda i: (i, 0)),   # x tile (pipelined)
            pl.BlockSpec((k_pad, n_pad), lambda i: (0, 0)),    # weights (VMEM-resident)
            pl.BlockSpec((1, n_pad), lambda i: (0, 0)),        # bias
            pl.BlockSpec((1, n_pad), lambda i: (0, 0)),        # bn scale
            pl.BlockSpec((1, n_pad), lambda i: (0, 0)),        # bn shift
        ],
        out_specs=pl.BlockSpec((tile_r, n_pad), lambda i: (i, 0)),
        compiler_params=pltpu.CompilerParams(
            dimension_semantics=("parallel",),
            vmem_limit_bytes=32 * 1024 * 1024,
        ),
        cost_estimate=cost,
    )(x_p, w_p, b_p, s_p, t_p)

    out = out[:rows, :c_out].reshape(bsz, ho, wo, c_out)      # drop padding
    return out


def encoder_forward(x_nchw, params, *, pad_mode=1, compute_dtype=jnp.float32):
    """Forward pass of _Encoder (is_bn=True, activation=ReLU). Input/output are NCHW."""
    x = jnp.transpose(x_nchw, (0, 2, 3, 1))                   # NCHW -> NHWC (lane = C)
    x = _conv_relu_bn_layer(x, params["layer0"], ksize=5, stride=2, padding=2,
                            compute_dtype=compute_dtype)
    x = _conv_relu_bn_layer(x, params["layer1"], ksize=5, stride=2, padding=2,
                            compute_dtype=compute_dtype)
    x = _conv_relu_bn_layer(x, params["layer2"], ksize=3, stride=2, padding=pad_mode,
                            compute_dtype=compute_dtype)
    return jnp.transpose(x, (0, 3, 1, 2))                     # NHWC -> NCHW


# --------------------------------------------------------------------------------------
# Parameter init (mirrors nn.Conv2d default init; BN params randomized so the
# folded affine is exercised) and a pure-JAX reference.
# --------------------------------------------------------------------------------------
def init_params(key, in_channels, hidden_layer_sizes):
    specs = [(in_channels, hidden_layer_sizes[0], 5),
             (hidden_layer_sizes[0], hidden_layer_sizes[1], 5),
             (hidden_layer_sizes[1], hidden_layer_sizes[2], 3)]
    params = {}
    for i, (cin, cout, k) in enumerate(specs):
        key, kw_, kb_, kg_, kbt_, km_, kv_ = jax.random.split(key, 7)
        bound = 1.0 / (cin * k * k) ** 0.5
        params[f"layer{i}"] = dict(
            w=jax.random.uniform(kw_, (cout, cin, k, k), jnp.float32, -bound, bound),
            b=jax.random.uniform(kb_, (cout,), jnp.float32, -bound, bound),
            gamma=jax.random.uniform(kg_, (cout,), jnp.float32, 0.5, 1.5),
            beta=0.1 * jax.random.normal(kbt_, (cout,), jnp.float32),
            mean=0.1 * jax.random.normal(km_, (cout,), jnp.float32),
            var=jax.random.uniform(kv_, (cout,), jnp.float32, 0.5, 1.5),
        )
    return params


def reference_forward(x_nchw, params, *, pad_mode=1):
    """Plain-JAX (XLA) reference of the same forward pass."""
    x = x_nchw
    specs = [(5, 2, 2), (5, 2, 2), (3, 2, pad_mode)]
    for i, (k, s, p) in enumerate(specs):
        lp = params[f"layer{i}"]
        x = jax.lax.conv_general_dilated(
            x, lp["w"], window_strides=(s, s), padding=[(p, p), (p, p)],
            dimension_numbers=("NCHW", "OIHW", "NCHW"),
            precision=jax.lax.Precision.HIGHEST)
        x = x + lp["b"][None, :, None, None]
        x = jnp.maximum(x, 0.0)
        scale = lp["gamma"] / jnp.sqrt(lp["var"] + _BN_EPS)
        shift = lp["beta"] - lp["mean"] * scale
        x = x * scale[None, :, None, None] + shift[None, :, None, None]
    return x


if __name__ == "__main__":
    # Small shapes consistent with the module: batch=8, in_channels=3, 32x32 images,
    # hidden_layer_sizes=(16, 32, 64), pad_mode=1 -> output [8, 64, 4, 4].
    batch, in_channels, spatial = 8, 3, 32
    hidden_layer_sizes = (16, 32, 64)
    pad_mode = 1

    key = jax.random.PRNGKey(0)
    key, kx = jax.random.split(key)
    x = jax.random.normal(kx, (batch, in_channels, spatial, spatial), jnp.float32)
    params = init_params(key, in_channels, hidden_layer_sizes)

    fwd = jax.jit(functools.partial(encoder_forward, pad_mode=pad_mode))
    out = jax.block_until_ready(fwd(x, params))

    ref = reference_forward(x, params, pad_mode=pad_mode)
    assert out.shape == (batch, hidden_layer_sizes[-1], 4, 4), out.shape
    assert jnp.allclose(out, ref, atol=1e-3, rtol=1e-3), (
        float(jnp.max(jnp.abs(out - ref))))

    print("KERNEL_OK")
</pallas_src>

<mosaic_0001>
module attributes {stable_mosaic.version = 11 : i64} {
  func.func @_gemm_bias_relu_bn_kernel(%arg0: i32, %arg1: memref<256x128xf32, #tpu.memory_space<vmem>>, %arg2: memref<128x128xf32, #tpu.memory_space<vmem>>, %arg3: memref<1x128xf32, #tpu.memory_space<vmem>>, %arg4: memref<1x128xf32, #tpu.memory_space<vmem>>, %arg5: memref<1x128xf32, #tpu.memory_space<vmem>>, %arg6: memref<256x128xf32, #tpu.memory_space<vmem>>) attributes {dimension_semantics = [#tpu.dimension_semantics<parallel>], iteration_bounds = array<i64: 8>, scalar_prefetch = 0 : i64, scratch_operands = 0 : i64, tpu.core_type = #tpu.core_type<tc>, window_params = [{transform_indices = @transform_0, window_bounds = array<i64: 256, 128>}, {pipeline_mode = #tpu.pipeline_mode<synchronous>, transform_indices = @transform_1, window_bounds = array<i64: 128, 128>}, {pipeline_mode = #tpu.pipeline_mode<synchronous>, transform_indices = @transform_2, window_bounds = array<i64: 1, 128>}, {pipeline_mode = #tpu.pipeline_mode<synchronous>, transform_indices = @transform_3, window_bounds = array<i64: 1, 128>}, {pipeline_mode = #tpu.pipeline_mode<synchronous>, transform_indices = @transform_4, window_bounds = array<i64: 1, 128>}, {transform_indices = @transform_5, window_bounds = array<i64: 256, 128>}]} {
    %c0 = arith.constant 0 : index
    %c0_0 = arith.constant 0 : index
    %0 = vector.load %arg1[%c0, %c0_0] : memref<256x128xf32, #tpu.memory_space<vmem>>, vector<256x128xf32>
    %c0_1 = arith.constant 0 : index
    %c0_2 = arith.constant 0 : index
    %1 = vector.load %arg2[%c0_1, %c0_2] : memref<128x128xf32, #tpu.memory_space<vmem>>, vector<128x128xf32>
    %cst = arith.constant dense<0.000000e+00> : vector<256x128xf32>
    %2 = tpu.matmul %0, %1, %cst {dimension_numbers = #tpu.dot_dimension_numbers<[1], [0], [0], [1], [0, 0, 1, 1], [], []>} : vector<256x128xf32>, vector<128x128xf32>, vector<256x128xf32> -> vector<256x128xf32>
    %c0_3 = arith.constant 0 : index
    %c0_4 = arith.constant 0 : index
    %3 = vector.load %arg3[%c0_3, %c0_4] : memref<1x128xf32, #tpu.memory_space<vmem>>, vector<1x128xf32>
    %4 = vector.broadcast %3 : vector<1x128xf32> to vector<256x128xf32>
    %5 = arith.addf %2, %4 : vector<256x128xf32>
    %cst_5 = arith.constant 0.000000e+00 : f32
    %6 = vector.broadcast %cst_5 : f32 to vector<256x128xf32>
    %7 = arith.maximumf %5, %6 : vector<256x128xf32>
    %c0_6 = arith.constant 0 : index
    %c0_7 = arith.constant 0 : index
    %8 = vector.load %arg4[%c0_6, %c0_7] : memref<1x128xf32, #tpu.memory_space<vmem>>, vector<1x128xf32>
    %9 = vector.broadcast %8 : vector<1x128xf32> to vector<256x128xf32>
    %10 = arith.mulf %7, %9 : vector<256x128xf32>
    %c0_8 = arith.constant 0 : index
    %c0_9 = arith.constant 0 : index
    %11 = vector.load %arg5[%c0_8, %c0_9] : memref<1x128xf32, #tpu.memory_space<vmem>>, vector<1x128xf32>
    %12 = vector.broadcast %11 : vector<1x128xf32> to vector<256x128xf32>
    %13 = arith.addf %10, %12 : vector<256x128xf32>
    %c0_10 = arith.constant 0 : index
    %c0_11 = arith.constant 0 : index
    %14 = vector.load %arg6[%c0_10, %c0_11] : memref<256x128xf32, #tpu.memory_space<vmem>>, vector<256x128xf32>
    tpu.vector_store %arg6[%c0_10, %c0_11], %13 {strides = array<i32>} : memref<256x128xf32, #tpu.memory_space<vmem>>, vector<256x128xf32>,
    return
  }
  func.func @transform_0(%arg0: i32) -> (i32, i32) {
    %c0_i32 = arith.constant 0 : i32
    %c0_i32_0 = arith.constant 0 : i32
    return %arg0, %c0_i32 : i32, i32
  }
  func.func @transform_1(%arg0: i32) -> (i32, i32) {
    %c0_i32 = arith.constant 0 : i32
    %c0_i32_0 = arith.constant 0 : i32
    %c0_i32_1 = arith.constant 0 : i32
    return %c0_i32, %c0_i32_0 : i32, i32
  }
  func.func @transform_2(%arg0: i32) -> (i32, i32) {
    %c0_i32 = arith.constant 0 : i32
    %c0_i32_0 = arith.constant 0 : i32
    %c0_i32_1 = arith.constant 0 : i32
    return %c0_i32, %c0_i32_0 : i32, i32
  }
  func.func @transform_3(%arg0: i32) -> (i32, i32) {
    %c0_i32 = arith.constant 0 : i32
    %c0_i32_0 = arith.constant 0 : i32
    %c0_i32_1 = arith.constant 0 : i32
    return %c0_i32, %c0_i32_0 : i32, i32
  }
  func.func @transform_4(%arg0: i32) -> (i32, i32) {
    %c0_i32 = arith.constant 0 : i32
    %c0_i32_0 = arith.constant 0 : i32
    %c0_i32_1 = arith.constant 0 : i32
    return %c0_i32, %c0_i32_0 : i32, i32
  }
  func.func @transform_5(%arg0: i32) -> (i32, i32) {
    %c0_i32 = arith.constant 0 : i32
    %c0_i32_0 = arith.constant 0 : i32
    return %arg0, %c0_i32 : i32, i32
  }
}

module attributes {stable_mosaic.version = 11 : i64} {
  func.func @_gemm_bias_relu_bn_kernel(%arg0: i32, %arg1: memref<256x512xf32, #tpu.memory_space<vmem>>, %arg2: memref<512x128xf32, #tpu.memory_space<vmem>>, %arg3: memref<1x128xf32, #tpu.memory_space<vmem>>, %arg4: memref<1x128xf32, #tpu.memory_space<vmem>>, %arg5: memref<1x128xf32, #tpu.memory_space<vmem>>, %arg6: memref<256x128xf32, #tpu.memory_space<vmem>>) attributes {dimension_semantics = [#tpu.dimension_semantics<parallel>], iteration_bounds = array<i64: 2>, scalar_prefetch = 0 : i64, scratch_operands = 0 : i64, tpu.core_type = #tpu.core_type<tc>, window_params = [{transform_indices = @transform_0, window_bounds = array<i64: 256, 512>}, {pipeline_mode = #tpu.pipeline_mode<synchronous>, transform_indices = @transform_1, window_bounds = array<i64: 512, 128>}, {pipeline_mode = #tpu.pipeline_mode<synchronous>, transform_indices = @transform_2, window_bounds = array<i64: 1, 128>}, {pipeline_mode = #tpu.pipeline_mode<synchronous>, transform_indices = @transform_3, window_bounds = array<i64: 1, 128>}, {pipeline_mode = #tpu.pipeline_mode<synchronous>, transform_indices = @transform_4, window_bounds = array<i64: 1, 128>}, {transform_indices = @transform_5, window_bounds = array<i64: 256, 128>}]} {
    %c0 = arith.constant 0 : index
    %c0_0 = arith.constant 0 : index
    %0 = vector.load %arg1[%c0, %c0_0] : memref<256x512xf32, #tpu.memory_space<vmem>>, vector<256x512xf32>
    %c0_1 = arith.constant 0 : index
    %c0_2 = arith.constant 0 : index
    %1 = vector.load %arg2[%c0_1, %c0_2] : memref<512x128xf32, #tpu.memory_space<vmem>>, vector<512x128xf32>
    %cst = arith.constant dense<0.000000e+00> : vector<256x128xf32>
    %2 = tpu.matmul %0, %1, %cst {dimension_numbers = #tpu.dot_dimension_numbers<[1], [0], [0], [1], [0, 0, 1, 1], [], []>} : vector<256x512xf32>, vector<512x128xf32>, vector<256x128xf32> -> vector<256x128xf32>
    %c0_3 = arith.constant 0 : index
    %c0_4 = arith.constant 0 : index
    %3 = vector.load %arg3[%c0_3, %c0_4] : memref<1x128xf32, #tpu.memory_space<vmem>>, vector<1x128xf32>
    %4 = vector.broadcast %3 : vector<1x128xf32> to vector<256x128xf32>
    %5 = arith.addf %2, %4 : vector<256x128xf32>
    %cst_5 = arith.constant 0.000000e+00 : f32
    %6 = vector.broadcast %cst_5 : f32 to vector<256x128xf32>
    %7 = arith.maximumf %5, %6 : vector<256x128xf32>
    %c0_6 = arith.constant 0 : index
    %c0_7 = arith.constant 0 : index
    %8 = vector.load %arg4[%c0_6, %c0_7] : memref<1x128xf32, #tpu.memory_space<vmem>>, vector<1x128xf32>
    %9 = vector.broadcast %8 : vector<1x128xf32> to vector<256x128xf32>
    %10 = arith.mulf %7, %9 : vector<256x128xf32>
    %c0_8 = arith.constant 0 : index
    %c0_9 = arith.constant 0 : index
    %11 = vector.load %arg5[%c0_8, %c0_9] : memref<1x128xf32, #tpu.memory_space<vmem>>, vector<1x128xf32>
    %12 = vector.broadcast %11 : vector<1x128xf32> to vector<256x128xf32>
    %13 = arith.addf %10, %12 : vector<256x128xf32>
    %c0_10 = arith.constant 0 : index
    %c0_11 = arith.constant 0 : index
    %14 = vector.load %arg6[%c0_10, %c0_11] : memref<256x128xf32, #tpu.memory_space<vmem>>, vector<256x128xf32>
    tpu.vector_store %arg6[%c0_10, %c0_11], %13 {strides = array<i32>} : memref<256x128xf32, #tpu.memory_space<vmem>>, vector<256x128xf32>,
    return
  }
  func.func @transform_0(%arg0: i32) -> (i32, i32) {
    %c0_i32 = arith.constant 0 : i32
    %c0_i32_0 = arith.constant 0 : i32
    return %arg0, %c0_i32 : i32, i32
  }
  func.func @transform_1(%arg0: i32) -> (i32, i32) {
    %c0_i32 = arith.constant 0 : i32
    %c0_i32_0 = arith.constant 0 : i32
    %c0_i32_1 = arith.constant 0 : i32
    return %c0_i32, %c0_i32_0 : i32, i32
  }
  func.func @transform_2(%arg0: i32) -> (i32, i32) {
    %c0_i32 = arith.constant 0 : i32
    %c0_i32_0 = arith.constant 0 : i32
    %c0_i32_1 = arith.constant 0 : i32
    return %c0_i32, %c0_i32_0 : i32, i32
  }
  func.func @transform_3(%arg0: i32) -> (i32, i32) {
    %c0_i32 = arith.constant 0 : i32
    %c0_i32_0 = arith.constant 0 : i32
    %c0_i32_1 = arith.constant 0 : i32
    return %c0_i32, %c0_i32_0 : i32, i32
  }
  func.func @transform_4(%arg0: i32) -> (i32, i32) {
    %c0_i32 = arith.constant 0 : i32
    %c0_i32_0 = arith.constant 0 : i32
    %c0_i32_1 = arith.constant 0 : i32
    return %c0_i32, %c0_i32_0 : i32, i32
  }
  func.func @transform_5(%arg0: i32) -> (i32, i32) {
    %c0_i32 = arith.constant 0 : i32
    %c0_i32_0 = arith.constant 0 : i32
    return %arg0, %c0_i32 : i32, i32
  }
}

module attributes {stable_mosaic.version = 11 : i64} {
  func.func @_gemm_bias_relu_bn_kernel(%arg0: i32, %arg1: memref<128x384xf32, #tpu.memory_space<vmem>>, %arg2: memref<384x128xf32, #tpu.memory_space<vmem>>, %arg3: memref<1x128xf32, #tpu.memory_space<vmem>>, %arg4: memref<1x128xf32, #tpu.memory_space<vmem>>, %arg5: memref<1x128xf32, #tpu.memory_space<vmem>>, %arg6: memref<128x128xf32, #tpu.memory_space<vmem>>) attributes {dimension_semantics = [#tpu.dimension_semantics<parallel>], iteration_bounds = array<i64: 1>, scalar_prefetch = 0 : i64, scratch_operands = 0 : i64, tpu.core_type = #tpu.core_type<tc>, window_params = [{transform_indices = @transform_0, window_bounds = array<i64: 128, 384>}, {pipeline_mode = #tpu.pipeline_mode<synchronous>, transform_indices = @transform_1, window_bounds = array<i64: 384, 128>}, {pipeline_mode = #tpu.pipeline_mode<synchronous>, transform_indices = @transform_2, window_bounds = array<i64: 1, 128>}, {pipeline_mode = #tpu.pipeline_mode<synchronous>, transform_indices = @transform_3, window_bounds = array<i64: 1, 128>}, {pipeline_mode = #tpu.pipeline_mode<synchronous>, transform_indices = @transform_4, window_bounds = array<i64: 1, 128>}, {transform_indices = @transform_5, window_bounds = array<i64: 128, 128>}]} {
    %c0 = arith.constant 0 : index
    %c0_0 = arith.constant 0 : index
    %0 = vector.load %arg1[%c0, %c0_0] : memref<128x384xf32, #tpu.memory_space<vmem>>, vector<128x384xf32>
    %c0_1 = arith.constant 0 : index
    %c0_2 = arith.constant 0 : index
    %1 = vector.load %arg2[%c0_1, %c0_2] : memref<384x128xf32, #tpu.memory_space<vmem>>, vector<384x128xf32>
    %cst = arith.constant dense<0.000000e+00> : vector<128x128xf32>
    %2 = tpu.matmul %0, %1, %cst {dimension_numbers = #tpu.dot_dimension_numbers<[1], [0], [0], [1], [0, 0, 1, 1], [], []>} : vector<128x384xf32>, vector<384x128xf32>, vector<128x128xf32> -> vector<128x128xf32>
    %c0_3 = arith.constant 0 : index
    %c0_4 = arith.constant 0 : index
    %3 = vector.load %arg3[%c0_3, %c0_4] : memref<1x128xf32, #tpu.memory_space<vmem>>, vector<1x128xf32>
    %4 = vector.broadcast %3 : vector<1x128xf32> to vector<128x128xf32>
    %5 = arith.addf %2, %4 : vector<128x128xf32>
    %cst_5 = arith.constant 0.000000e+00 : f32
    %6 = vector.broadcast %cst_5 : f32 to vector<128x128xf32>
    %7 = arith.maximumf %5, %6 : vector<128x128xf32>
    %c0_6 = arith.constant 0 : index
    %c0_7 = arith.constant 0 : index
    %8 = vector.load %arg4[%c0_6, %c0_7] : memref<1x128xf32, #tpu.memory_space<vmem>>, vector<1x128xf32>
    %9 = vector.broadcast %8 : vector<1x128xf32> to vector<128x128xf32>
    %10 = arith.mulf %7, %9 : vector<128x128xf32>
    %c0_8 = arith.constant 0 : index
    %c0_9 = arith.constant 0 : index
    %11 = vector.load %arg5[%c0_8, %c0_9] : memref<1x128xf32, #tpu.memory_space<vmem>>, vector<1x128xf32>
    %12 = vector.broadcast %11 : vector<1x128xf32> to vector<128x128xf32>
    %13 = arith.addf %10, %12 : vector<128x128xf32>
    %c0_10 = arith.constant 0 : index
    %c0_11 = arith.constant 0 : index
    %14 = vector.load %arg6[%c0_10, %c0_11] : memref<128x128xf32, #tpu.memory_space<vmem>>, vector<128x128xf32>
    tpu.vector_store %arg6[%c0_10, %c0_11], %13 {strides = array<i32>} : memref<128x128xf32, #tpu.memory_space<vmem>>, vector<128x128xf32>,
    return
  }
  func.func @transform_0(%arg0: i32) -> (i32, i32) {
    %c0_i32 = arith.constant 0 : i32
    %c0_i32_0 = arith.constant 0 : i32
    return %arg0, %c0_i32 : i32, i32
  }
  func.func @transform_1(%arg0: i32) -> (i32, i32) {
    %c0_i32 = arith.constant 0 : i32
    %c0_i32_0 = arith.constant 0 : i32
    %c0_i32_1 = arith.constant 0 : i32
    return %c0_i32, %c0_i32_0 : i32, i32
  }
  func.func @transform_2(%arg0: i32) -> (i32, i32) {
    %c0_i32 = arith.constant 0 : i32
    %c0_i32_0 = arith.constant 0 : i32
    %c0_i32_1 = arith.constant 0 : i32
    return %c0_i32, %c0_i32_0 : i32, i32
  }
  func.func @transform_3(%arg0: i32) -> (i32, i32) {
    %c0_i32 = arith.constant 0 : i32
    %c0_i32_0 = arith.constant 0 : i32
    %c0_i32_1 = arith.constant 0 : i32
    return %c0_i32, %c0_i32_0 : i32, i32
  }
  func.func @transform_4(%arg0: i32) -> (i32, i32) {
    %c0_i32 = arith.constant 0 : i32
    %c0_i32_0 = arith.constant 0 : i32
    %c0_i32_1 = arith.constant 0 : i32
    return %c0_i32, %c0_i32_0 : i32, i32
  }
  func.func @transform_5(%arg0: i32) -> (i32, i32) {
    %c0_i32 = arith.constant 0 : i32
    %c0_i32_0 = arith.constant 0 : i32
    return %arg0, %c0_i32 : i32, i32
  }
}

</mosaic_0001>

<bundles_post_ra>
// kernel: encoder_forward.3
= control target key start
LH: loop header
LB: loop body
LE: loop exit
PB: predicated region body
PF: predicated region fallthrough
CT: control target
= control target key end

     0   :  { %s693_s18 = smov 0   ;;  %s946_s0 = inlined_call_operand.vmem [shape: f32[2048,128], index: 0, kind: input, shape index: {}]   ;;  %s947_s1 = inlined_call_operand.vmem [shape: f32[128,128], index: 1, kind: input, shape index: {}]   ;;  %s948_s2 = inlined_call_operand.vmem [shape: f32[1,128], index: 2, kind: input, shape index: {}]   ;;  %s949_s3 = inlined_call_operand.vmem [shape: f32[1,128], index: 3, kind: input, shape index: {}]   ;;  %s950_s4 = inlined_call_operand.vmem [shape: f32[1,128], index: 4, kind: input, shape index: {}]   ;;  %s951_s5 = inlined_call_operand.vmem [shape: f32[2048,128], index: 5, kind: output, shape index: {}]  }
   0x1 LB: > { %s585_s19 = sadd.s32 4294967295, %s661_s18   ;;  %p589_p0 = scmp.ge.s32.totalorder %s661_s18, 1  ;;  %s661_s18 = sphi %s693_s18, %s15_s18  }
   0x2   : > { %p188_p1 = scmp.lt.s32.totalorder %s661_s18, 9 }
   0x4   : > { %p189_p2 = pnand %p589_p0, %p188_p1 }
   0x5   : > { %s590_s11 = sshll.u32 (!%p189_p2), %s585_s19, 5 }
   0x6   : > { %192 = sbr.rel (%p189_p2) target bundleno = 241 (0xf1), region = 40  ;;  %p217_p3 = scmp.lt.s32.totalorder (!%p189_p2), %s590_s11, 255 }
   0xb   : > { %v275_v0 = vld [vmem:[%s947_s1 + $0x78] sm:$0xff]  ;;  %v274_v1 = vld [vmem:[%s947_s1 + $0x70] sm:$0xff]  ;;  %v273_v2 = vld [vmem:[%s947_s1 + $0x68] sm:$0xff]  ;;  %s953_s11 = smov (!%p217_p3, %s590_s11), 255 }
   0xc   : > { %597 = vmatpush.msra.mxu2 %v275_v0  ;;  %598 = vmatpush.msra.mxu3 %v275_v0  ;;  %v272_v3 = vld [vmem:[%s947_s1 + $0x60] sm:$0xff]  ;;  %v271_v4 = vld [vmem:[%s947_s1 + $0x58] sm:$0xff]  ;;  %v270_v5 = vld [vmem:[%s947_s1 + $0x50] sm:$0xff]  ;;  %s591_s23 = sshll.u32 %s953_s11, 3 }
   0xd   : > { %280 = vmatpush.msra.mxu0 %v275_v0  ;;  %596 = vmatpush.msra.mxu1 %v275_v0  ;;  %v269_v6 = vld [vmem:[%s947_s1 + $0x48] sm:$0xff]  ;;  %v268_v7 = vld [vmem:[%s947_s1 + $0x40] sm:$0xff]  ;;  %v267_v8 = vld [vmem:[%s947_s1 + $0x38] sm:$0xff]  ;;  %s756_s30 = scalar_lea.vmem %s946_s0, %s591_s23  ;;  %s819_s17 = scalar_lea.vmem %s951_s5, %s591_s23 }
   0xe   : > { %600 = vmatpush.msra.mxu2 %v274_v1  ;;  %601 = vmatpush.msra.mxu3 %v274_v1  ;;  %v266_v9 = vld [vmem:[%s947_s1 + $0x30] sm:$0xff]  ;;  %v265_v10 = vld [vmem:[%s947_s1 + $0x28] sm:$0xff]  ;;  %v264_v11 = vld [vmem:[%s947_s1 + $0x20] sm:$0xff] }
   0xf   : > { %281 = vmatpush.msra.mxu0 %v274_v1  ;;  %599 = vmatpush.msra.mxu1 %v274_v1  ;;  %v263_v12 = vld [vmem:[%s947_s1 + $0x18] sm:$0xff]  ;;  %v262_v13 = vld [vmem:[%s947_s1 + $0x10] sm:$0xff]  ;;  %v261_v14 = vld [vmem:[%s947_s1 + $0x8] sm:$0xff] }
  0x10   : > { %603 = vmatpush.msra.mxu2 %v273_v2  ;;  %604 = vmatpush.msra.mxu3 %v273_v2  ;;  %v260_v15 = vld [vmem:[%s947_s1] sm:$0xff]  ;;  %v245_v20 = vld [vmem:[%s756_s30 + $0x88] sm:$0xff]  ;;  %v246_v24 = vld [vmem:[%s756_s30 + $0x90] sm:$0xff] }
  0x11   : > { %282 = vmatpush.msra.mxu0 %v273_v2  ;;  %602 = vmatpush.msra.mxu1 %v273_v2  ;;  %v244_v16 = vld [vmem:[%s756_s30 + $0x80] sm:$0xff]  ;;  %v253_v21 = vld [vmem:[%s756_s30 + $0xc8] sm:$0xff]  ;;  %v254_v25 = vld [vmem:[%s756_s30 + $0xd0] sm:$0xff] }
  0x12   : > { %606 = vmatpush.msra.mxu2 %v272_v3  ;;  %607 = vmatpush.msra.mxu3 %v272_v3  ;;  %v252_v17 = vld [vmem:[%s756_s30 + $0xc0] sm:$0xff]  ;;  %v229_v22 = vld [vmem:[%s756_s30 + $0x8] sm:$0xff]  ;;  %v230_v26 = vld [vmem:[%s756_s30 + $0x10] sm:$0xff] }
  0x13   : > { %283 = vmatpush.msra.mxu0 %v272_v3  ;;  %605 = vmatpush.msra.mxu1 %v272_v3  ;;  %v228_v18 = vld [vmem:[%s756_s30] sm:$0xff]  ;;  %v237_v23 = vld [vmem:[%s756_s30 + $0x48] sm:$0xff]  ;;  %v238_v27 = vld [vmem:[%s756_s30 + $0x50] sm:$0xff] }
  0x14   : > { %609 = vmatpush.msra.mxu2 %v271_v4  ;;  %610 = vmatpush.msra.mxu3 %v271_v4  ;;  %v236_v19 = vld [vmem:[%s756_s30 + $0x40] sm:$0xff]  ;;  %v247_v28 = vld [vmem:[%s756_s30 + $0x98] sm:$0xff]  ;;  %v249_v36 = vld [vmem:[%s756_s30 + $0xa8] sm:$0xff] }
  0x15   : > { %284 = vmatpush.msra.mxu0 %v271_v4  ;;  %608 = vmatpush.msra.mxu1 %v271_v4  ;;  %v255_v29 = vld [vmem:[%s756_s30 + $0xd8] sm:$0xff]  ;;  %v248_v32 = vld [vmem:[%s756_s30 + $0xa0] sm:$0xff]  ;;  %v257_v37 = vld [vmem:[%s756_s30 + $0xe8] sm:$0xff] }
  0x16   : > { %612 = vmatpush.msra.mxu2 %v270_v5  ;;  %613 = vmatpush.msra.mxu3 %v270_v5  ;;  %v231_v30 = vld [vmem:[%s756_s30 + $0x18] sm:$0xff]  ;;  %v256_v33 = vld [vmem:[%s756_s30 + $0xe0] sm:$0xff]  ;;  %v233_v38 = vld [vmem:[%s756_s30 + $0x28] sm:$0xff] }
  0x17   : > { %285 = vmatpush.msra.mxu0 %v270_v5  ;;  %611 = vmatpush.msra.mxu1 %v270_v5  ;;  %v239_v31 = vld [vmem:[%s756_s30 + $0x58] sm:$0xff]  ;;  %v232_v34 = vld [vmem:[%s756_s30 + $0x20] sm:$0xff]  ;;  %v241_v39 = vld [vmem:[%s756_s30 + $0x68] sm:$0xff] }
  0x18   : > { %615 = vmatpush.msra.mxu2 %v269_v6  ;;  %616 = vmatpush.msra.mxu3 %v269_v6  ;;  %v240_v35 = vld [vmem:[%s756_s30 + $0x60] sm:$0xff]  ;;  %v250_v40 = vld [vmem:[%s756_s30 + $0xb0] sm:$0xff]  ;;  %v251_v44 = vld [vmem:[%s756_s30 + $0xb8] sm:$0xff] }
  0x19   : > { %286 = vmatpush.msra.mxu0 %v269_v6  ;;  %614 = vmatpush.msra.mxu1 %v269_v6  ;;  %v258_v41 = vld [vmem:[%s756_s30 + $0xf0] sm:$0xff]  ;;  %v259_v45 = vld [vmem:[%s756_s30 + $0xf8] sm:$0xff]  ;;  %v796_v48 = vld [vmem:[%s948_s2] ss:$0 sm:$0xff] }
  0x1a   : > { %618 = vmatpush.msra.mxu2 %v268_v7  ;;  %619 = vmatpush.msra.mxu3 %v268_v7  ;;  %v234_v42 = vld [vmem:[%s756_s30 + $0x30] sm:$0xff]  ;;  %v235_v46 = vld [vmem:[%s756_s30 + $0x38] sm:$0xff]  ;;  %v802_v52 = vld [vmem:[%s949_s3] ss:$0 sm:$0xff] }
  0x1b   : > { %287 = vmatpush.msra.mxu0 %v268_v7  ;;  %617 = vmatpush.msra.mxu1 %v268_v7  ;;  %v242_v43 = vld [vmem:[%s756_s30 + $0x70] sm:$0xff]  ;;  %v243_v47 = vld [vmem:[%s756_s30 + $0x78] sm:$0xff]  ;;  %v808_v55 = vld [vmem:[%s950_s4] ss:$0 sm:$0xff] }
  0x1c   : > { %621 = vmatpush.msra.mxu2 %v267_v8  ;;  %622 = vmatpush.msra.mxu3 %v267_v8 }
  0x1d   : > { %288 = vmatpush.msra.mxu0 %v267_v8  ;;  %620 = vmatpush.msra.mxu1 %v267_v8 }
  0x1e   : > { %624 = vmatpush.msra.mxu2 %v266_v9  ;;  %625 = vmatpush.msra.mxu3 %v266_v9 }
  0x1f   : > { %289 = vmatpush.msra.mxu0 %v266_v9  ;;  %623 = vmatpush.msra.mxu1 %v266_v9 }
  0x20   : > { %627 = vmatpush.msra.mxu2 %v265_v10  ;;  %628 = vmatpush.msra.mxu3 %v265_v10 }
  0x21   : > { %290 = vmatpush.msra.mxu0 %v265_v10  ;;  %626 = vmatpush.msra.mxu1 %v265_v10 }
  0x22   : > { %630 = vmatpush.msra.mxu2 %v264_v11  ;;  %631 = vmatpush.msra.mxu3 %v264_v11 }
  0x23   : > { %291 = vmatpush.msra.mxu0 %v264_v11  ;;  %629 = vmatpush.msra.mxu1 %v264_v11 }
  0x24   : > { %633 = vmatpush.msra.mxu2 %v263_v12  ;;  %634 = vmatpush.msra.mxu3 %v263_v12 }
  0x25   : > { %292 = vmatpush.msra.mxu0 %v263_v12  ;;  %632 = vmatpush.msra.mxu1 %v263_v12 }
  0x26   : > { %636 = vmatpush.msra.mxu2 %v262_v13  ;;  %637 = vmatpush.msra.mxu3 %v262_v13 }
  0x27   : > { %293 = vmatpush.msra.mxu0 %v262_v13  ;;  %635 = vmatpush.msra.mxu1 %v262_v13 }
  0x28   : > { %639 = vmatpush.msra.mxu2 %v261_v14  ;;  %640 = vmatpush.msra.mxu3 %v261_v14 }
  0x29   : > { %294 = vmatpush.msra.mxu0 %v261_v14  ;;  %638 = vmatpush.msra.mxu1 %v261_v14 }
  0x2a   : > { %642 = vmatpush.msra.mxu2 %v260_v15  ;;  %643 = vmatpush.msra.mxu3 %v260_v15 }
  0x2b   : > { %344 = vmatmul.f32.vlgmr.msra.gmra.mxu2 %v244_v16  ;;  %368 = vmatmul.f32.vlgmr.msra.gmra.mxu3 %v252_v17 }
  0x2c   : > { %295 = vmatpush.msra.mxu0 %v260_v15  ;;  %641 = vmatpush.msra.mxu1 %v260_v15 }
  0x2d   : > { %296 = vmatmul.f32.vlgmr.msra.gmra.mxu0 %v228_v18  ;;  %320 = vmatmul.f32.vlgmr.msra.gmra.mxu1 %v236_v19 }
  0x33   : > { %347 = vmatmul.f32.gmra.mxu2 %v245_v20  ;;  %371 = vmatmul.f32.gmra.mxu3 %v253_v21 }
  0x35   : > { %299 = vmatmul.f32.gmra.mxu0 %v229_v22  ;;  %323 = vmatmul.f32.gmra.mxu1 %v237_v23 }
  0x3b   : > { %350 = vmatmul.f32.gmra.mxu2 %v246_v24  ;;  %374 = vmatmul.f32.gmra.mxu3 %v254_v25 }
  0x3d   : > { %302 = vmatmul.f32.gmra.mxu0 %v230_v26  ;;  %326 = vmatmul.f32.gmra.mxu1 %v238_v27 }
  0x43   : > { %353 = vmatmul.f32.gmra.mxu2 %v247_v28  ;;  %377 = vmatmul.f32.gmra.mxu3 %v255_v29 }
  0x45   : > { %305 = vmatmul.f32.gmra.mxu0 %v231_v30  ;;  %329 = vmatmul.f32.gmra.mxu1 %v239_v31 }
  0x4b   : > { %356 = vmatmul.f32.gmra.mxu2 %v248_v32  ;;  %380 = vmatmul.f32.gmra.mxu3 %v256_v33 }
  0x4d   : > { %308 = vmatmul.f32.gmra.mxu0 %v232_v34  ;;  %332 = vmatmul.f32.gmra.mxu1 %v240_v35 }
  0x53   : > { %359 = vmatmul.f32.gmra.mxu2 %v249_v36  ;;  %383 = vmatmul.f32.gmra.mxu3 %v257_v37 }
  0x55   : > { %311 = vmatmul.f32.gmra.mxu0 %v233_v38  ;;  %335 = vmatmul.f32.gmra.mxu1 %v241_v39 }
  0x5b   : > { %362 = vmatmul.f32.gmra.mxu2 %v250_v40  ;;  %386 = vmatmul.f32.gmra.mxu3 %v258_v41 }
  0x5d   : > { %314 = vmatmul.f32.gmra.mxu0 %v234_v42  ;;  %338 = vmatmul.f32.gmra.mxu1 %v242_v43 }
  0x63   : > { %365 = vmatmul.f32.gmra.mxu2 %v251_v44  ;;  %389 = vmatmul.f32.gmra.mxu3 %v259_v45 }
  0x65   : > { %317 = vmatmul.f32.gmra.mxu0 %v235_v46  ;;  %341 = vmatmul.f32.gmra.mxu1 %v243_v47 }
  0xaa   : > { %v297_v49 = vpop.f32.mrf.mxu0  ;;  %v321_v50 = vpop.f32.mrf.mxu1 }
  0xab   : > { %v298_v51 = vadd.f32 %v796_v48, %v297_v49  ;;  %v322_v53 = vadd.f32 %v796_v48, %v321_v50 }
  0xad   : > { %v393_v54 = vmax.f32 %v298_v51, 0.0  ;;  %v401_v56 = vmax.f32 %v322_v53, 0.0 }
  0xae   : > { %v345_v57 = vpop.f32.mrf.mxu2  ;;  %v369_v58 = vpop.f32.mrf.mxu3 }
  0xaf   : > { %v429_v59 = vmul.f32 %v802_v52, %v393_v54  ;;  %v437_v60 = vmul.f32 %v802_v52, %v401_v56  ;;  %v346_v61 = vadd.f32 %v796_v48, %v345_v57  ;;  %v370_v62 = vadd.f32 %v796_v48, %v369_v58 }
  0xb1   : > { %v465_v63 = vadd.f32 %v808_v55, %v429_v59  ;;  %v473_v0 = vadd.f32 %v808_v55, %v437_v60  ;;  %v409_v1 = vmax.f32 %v346_v61, 0.0  ;;  %v417_v2 = vmax.f32 %v370_v62, 0.0 }
  0xb2   : > { %v300_v3 = vpop.f32.mrf.mxu0  ;;  %v324_v4 = vpop.f32.mrf.mxu1 }
  0xb3   : > { %497 = vst [vmem:[%s819_s17] sm:$0xff] %v465_v63  ;;  %v445_v5 = vmul.f32 %v802_v52, %v409_v1  ;;  %v453_v6 = vmul.f32 %v802_v52, %v417_v2  ;;  %v301_v7 = vadd.f32 %v796_v48, %v300_v3  ;;  %v325_v8 = vadd.f32 %v796_v48, %v324_v4 }
  0xb4   : > { %505 = vst [vmem:[%s819_s17 + $0x40] sm:$0xff] %v473_v0 }
  0xb5   : > { %v481_v9 = vadd.f32 %v808_v55, %v445_v5  ;;  %v489_v10 = vadd.f32 %v808_v55, %v453_v6  ;;  %v394_v11 = vmax.f32 %v301_v7, 0.0  ;;  %v402_v12 = vmax.f32 %v325_v8, 0.0 }
  0xb6   : > { %v348_v13 = vpop.f32.mrf.mxu2  ;;  %v372_v14 = vpop.f32.mrf.mxu3 }
  0xb7   : > { %513 = vst [vmem:[%s819_s17 + $0x80] sm:$0xff] %v481_v9  ;;  %v430_v15 = vmul.f32 %v802_v52, %v394_v11  ;;  %v438_v16 = vmul.f32 %v802_v52, %v402_v12  ;;  %v349_v17 = vadd.f32 %v796_v48, %v348_v13  ;;  %v373_v18 = vadd.f32 %v796_v48, %v372_v14 }
  0xb8   : > { %521 = vst [vmem:[%s819_s17 + $0xc0] sm:$0xff] %v489_v10 }
  0xb9   : > { %v466_v19 = vadd.f32 %v808_v55, %v430_v15  ;;  %v474_v20 = vadd.f32 %v808_v55, %v438_v16  ;;  %v410_v21 = vmax.f32 %v349_v17, 0.0  ;;  %v418_v22 = vmax.f32 %v373_v18, 0.0 }
  0xba   : > { %v303_v23 = vpop.f32.mrf.mxu0  ;;  %v327_v24 = vpop.f32.mrf.mxu1 }
  0xbb   : > { %498 = vst [vmem:[%s819_s17 + $0x8] sm:$0xff] %v466_v19  ;;  %v446_v25 = vmul.f32 %v802_v52, %v410_v21  ;;  %v454_v26 = vmul.f32 %v802_v52, %v418_v22  ;;  %v304_v27 = vadd.f32 %v796_v48, %v303_v23  ;;  %v328_v28 = vadd.f32 %v796_v48, %v327_v24 }
  0xbc   : > { %506 = vst [vmem:[%s819_s17 + $0x48] sm:$0xff] %v474_v20 }
  0xbd   : > { %v482_v29 = vadd.f32 %v808_v55, %v446_v25  ;;  %v490_v30 = vadd.f32 %v808_v55, %v454_v26  ;;  %v395_v31 = vmax.f32 %v304_v27, 0.0  ;;  %v403_v32 = vmax.f32 %v328_v28, 0.0 }
  0xbe   : > { %v351_v33 = vpop.f32.mrf.mxu2  ;;  %v375_v34 = vpop.f32.mrf.mxu3 }
  0xbf   : > { %514 = vst [vmem:[%s819_s17 + $0x88] sm:$0xff] %v482_v29  ;;  %v431_v35 = vmul.f32 %v802_v52, %v395_v31  ;;  %v439_v36 = vmul.f32 %v802_v52, %v403_v32  ;;  %v352_v37 = vadd.f32 %v796_v48, %v351_v33  ;;  %v376_v38 = vadd.f32 %v796_v48, %v375_v34 }
  0xc0   : > { %522 = vst [vmem:[%s819_s17 + $0xc8] sm:$0xff] %v490_v30 }
  0xc1   : > { %v467_v39 = vadd.f32 %v808_v55, %v431_v35  ;;  %v475_v40 = vadd.f32 %v808_v55, %v439_v36  ;;  %v411_v41 = vmax.f32 %v352_v37, 0.0  ;;  %v419_v42 = vmax.f32 %v376_v38, 0.0 }
  0xc2   : > { %v306_v43 = vpop.f32.mrf.mxu0  ;;  %v330_v44 = vpop.f32.mrf.mxu1 }
  0xc3   : > { %499 = vst [vmem:[%s819_s17 + $0x10] sm:$0xff] %v467_v39  ;;  %v447_v45 = vmul.f32 %v802_v52, %v411_v41  ;;  %v455_v46 = vmul.f32 %v802_v52, %v419_v42  ;;  %v307_v47 = vadd.f32 %v796_v48, %v306_v43  ;;  %v331_v49 = vadd.f32 %v796_v48, %v330_v44 }
  0xc4   : > { %507 = vst [vmem:[%s819_s17 + $0x50] sm:$0xff] %v475_v40 }
  0xc5   : > { %v483_v50 = vadd.f32 %v808_v55, %v447_v45  ;;  %v491_v51 = vadd.f32 %v808_v55, %v455_v46  ;;  %v396_v53 = vmax.f32 %v307_v47, 0.0  ;;  %v404_v54 = vmax.f32 %v331_v49, 0.0 }
  0xc6   : > { %v354_v56 = vpop.f32.mrf.mxu2  ;;  %v378_v57 = vpop.f32.mrf.mxu3 }
  0xc7   : > { %515 = vst [vmem:[%s819_s17 + $0x90] sm:$0xff] %v483_v50  ;;  %v432_v58 = vmul.f32 %v802_v52, %v396_v53  ;;  %v440_v59 = vmul.f32 %v802_v52, %v404_v54  ;;  %v355_v60 = vadd.f32 %v796_v48, %v354_v56  ;;  %v379_v61 = vadd.f32 %v796_v48, %v378_v57 }
  0xc8   : > { %523 = vst [vmem:[%s819_s17 + $0xd0] sm:$0xff] %v491_v51 }
  0xc9   : > { %v468_v62 = vadd.f32 %v808_v55, %v432_v58  ;;  %v476_v63 = vadd.f32 %v808_v55, %v440_v59  ;;  %v412_v0 = vmax.f32 %v355_v60, 0.0  ;;  %v420_v1 = vmax.f32 %v379_v61, 0.0 }
  0xca   : > { %v309_v2 = vpop.f32.mrf.mxu0  ;;  %v333_v3 = vpop.f32.mrf.mxu1 }
  0xcb   : > { %500 = vst [vmem:[%s819_s17 + $0x18] sm:$0xff] %v468_v62  ;;  %v448_v4 = vmul.f32 %v802_v52, %v412_v0  ;;  %v456_v5 = vmul.f32 %v802_v52, %v420_v1  ;;  %v310_v6 = vadd.f32 %v796_v48, %v309_v2  ;;  %v334_v7 = vadd.f32 %v796_v48, %v333_v3 }
  0xcc   : > { %508 = vst [vmem:[%s819_s17 + $0x58] sm:$0xff] %v476_v63 }
  0xcd   : > { %v484_v8 = vadd.f32 %v808_v55, %v448_v4  ;;  %v492_v9 = vadd.f32 %v808_v55, %v456_v5  ;;  %v397_v10 = vmax.f32 %v310_v6, 0.0  ;;  %v405_v11 = vmax.f32 %v334_v7, 0.0 }
  0xce   : > { %v357_v12 = vpop.f32.mrf.mxu2  ;;  %v381_v13 = vpop.f32.mrf.mxu3 }
  0xcf   : > { %516 = vst [vmem:[%s819_s17 + $0x98] sm:$0xff] %v484_v8  ;;  %v433_v14 = vmul.f32 %v802_v52, %v397_v10  ;;  %v441_v15 = vmul.f32 %v802_v52, %v405_v11  ;;  %v358_v16 = vadd.f32 %v796_v48, %v357_v12  ;;  %v382_v17 = vadd.f32 %v796_v48, %v381_v13 }
  0xd0   : > { %524 = vst [vmem:[%s819_s17 + $0xd8] sm:$0xff] %v492_v9 }
  0xd1   : > { %v469_v18 = vadd.f32 %v808_v55, %v433_v14  ;;  %v477_v19 = vadd.f32 %v808_v55, %v441_v15  ;;  %v413_v20 = vmax.f32 %v358_v16, 0.0  ;;  %v421_v21 = vmax.f32 %v382_v17, 0.0 }
  0xd2   : > { %v312_v22 = vpop.f32.mrf.mxu0  ;;  %v336_v23 = vpop.f32.mrf.mxu1 }
  0xd3   : > { %501 = vst [vmem:[%s819_s17 + $0x20] sm:$0xff] %v469_v18  ;;  %v449_v24 = vmul.f32 %v802_v52, %v413_v20  ;;  %v457_v25 = vmul.f32 %v802_v52, %v421_v21  ;;  %v313_v26 = vadd.f32 %v796_v48, %v312_v22  ;;  %v337_v27 = vadd.f32 %v796_v48, %v336_v23 }
  0xd4   : > { %509 = vst [vmem:[%s819_s17 + $0x60] sm:$0xff] %v477_v19 }
  0xd5   : > { %v485_v28 = vadd.f32 %v808_v55, %v449_v24  ;;  %v493_v29 = vadd.f32 %v808_v55, %v457_v25  ;;  %v398_v30 = vmax.f32 %v313_v26, 0.0  ;;  %v406_v31 = vmax.f32 %v337_v27, 0.0 }
  0xd6   : > { %v360_v32 = vpop.f32.mrf.mxu2  ;;  %v384_v33 = vpop.f32.mrf.mxu3 }
  0xd7   : > { %517 = vst [vmem:[%s819_s17 + $0xa0] sm:$0xff] %v485_v28  ;;  %v434_v34 = vmul.f32 %v802_v52, %v398_v30  ;;  %v442_v35 = vmul.f32 %v802_v52, %v406_v31  ;;  %v361_v36 = vadd.f32 %v796_v48, %v360_v32  ;;  %v385_v37 = vadd.f32 %v796_v48, %v384_v33 }
  0xd8   : > { %525 = vst [vmem:[%s819_s17 + $0xe0] sm:$0xff] %v493_v29 }
  0xd9   : > { %v470_v38 = vadd.f32 %v808_v55, %v434_v34  ;;  %v478_v39 = vadd.f32 %v808_v55, %v442_v35  ;;  %v414_v40 = vmax.f32 %v361_v36, 0.0  ;;  %v422_v41 = vmax.f32 %v385_v37, 0.0 }
  0xda   : > { %v315_v42 = vpop.f32.mrf.mxu0  ;;  %v339_v43 = vpop.f32.mrf.mxu1 }
  0xdb   : > { %502 = vst [vmem:[%s819_s17 + $0x28] sm:$0xff] %v470_v38  ;;  %v450_v44 = vmul.f32 %v802_v52, %v414_v40  ;;  %v458_v45 = vmul.f32 %v802_v52, %v422_v41  ;;  %v316_v46 = vadd.f32 %v796_v48, %v315_v42  ;;  %v340_v47 = vadd.f32 %v796_v48, %v339_v43 }
  0xdc   : > { %510 = vst [vmem:[%s819_s17 + $0x68] sm:$0xff] %v478_v39 }
  0xdd   : > { %v486_v49 = vadd.f32 %v808_v55, %v450_v44  ;;  %v494_v50 = vadd.f32 %v808_v55, %v458_v45  ;;  %v399_v51 = vmax.f32 %v316_v46, 0.0  ;;  %v407_v53 = vmax.f32 %v340_v47, 0.0 }
  0xde   : > { %v363_v54 = vpop.f32.mrf.mxu2  ;;  %v387_v56 = vpop.f32.mrf.mxu3 }
  0xdf   : > { %518 = vst [vmem:[%s819_s17 + $0xa8] sm:$0xff] %v486_v49  ;;  %v435_v57 = vmul.f32 %v802_v52, %v399_v51  ;;  %v443_v58 = vmul.f32 %v802_v52, %v407_v53  ;;  %v364_v59 = vadd.f32 %v796_v48, %v363_v54  ;;  %v388_v60 = vadd.f32 %v796_v48, %v387_v56 }
  0xe0   : > { %526 = vst [vmem:[%s819_s17 + $0xe8] sm:$0xff] %v494_v50 }
  0xe1   : > { %v471_v61 = vadd.f32 %v808_v55, %v435_v57  ;;  %v479_v62 = vadd.f32 %v808_v55, %v443_v58  ;;  %v415_v63 = vmax.f32 %v364_v59, 0.0  ;;  %v423_v0 = vmax.f32 %v388_v60, 0.0 }
  0xe2   : > { %v318_v1 = vpop.f32.mrf.mxu0  ;;  %v342_v2 = vpop.f32.mrf.mxu1 }
  0xe3   : > { %503 = vst [vmem:[%s819_s17 + $0x30] sm:$0xff] %v471_v61  ;;  %v451_v3 = vmul.f32 %v802_v52, %v415_v63  ;;  %v459_v4 = vmul.f32 %v802_v52, %v423_v0  ;;  %v319_v5 = vadd.f32 %v796_v48, %v318_v1  ;;  %v343_v6 = vadd.f32 %v796_v48, %v342_v2 }
  0xe4   : > { %511 = vst [vmem:[%s819_s17 + $0x70] sm:$0xff] %v479_v62 }
  0xe5   : > { %v487_v7 = vadd.f32 %v808_v55, %v451_v3  ;;  %v495_v8 = vadd.f32 %v808_v55, %v459_v4  ;;  %v400_v9 = vmax.f32 %v319_v5, 0.0  ;;  %v408_v10 = vmax.f32 %v343_v6, 0.0 }
  0xe6   : > { %v366_v11 = vpop.f32.mrf.mxu2  ;;  %v390_v12 = vpop.f32.mrf.mxu3 }
  0xe7   : > { %519 = vst [vmem:[%s819_s17 + $0xb0] sm:$0xff] %v487_v7  ;;  %v436_v13 = vmul.f32 %v802_v52, %v400_v9  ;;  %v444_v14 = vmul.f32 %v802_v52, %v408_v10  ;;  %v367_v15 = vadd.f32 %v796_v48, %v366_v11  ;;  %v391_v16 = vadd.f32 %v796_v48, %v390_v12 }
  0xe8   : > { %527 = vst [vmem:[%s819_s17 + $0xf0] sm:$0xff] %v495_v8 }
  0xe9   : > { %v472_v17 = vadd.f32 %v808_v55, %v436_v13  ;;  %v480_v18 = vadd.f32 %v808_v55, %v444_v14  ;;  %v416_v19 = vmax.f32 %v367_v15, 0.0  ;;  %v424_v20 = vmax.f32 %v391_v16, 0.0 }
  0xeb   : > { %504 = vst [vmem:[%s819_s17 + $0x38] sm:$0xff] %v472_v17  ;;  %v452_v21 = vmul.f32 %v802_v52, %v416_v19  ;;  %v460_v22 = vmul.f32 %v802_v52, %v424_v20 }
  0xec   : > { %512 = vst [vmem:[%s819_s17 + $0x78] sm:$0xff] %v480_v18 }
  0xed   : > { %v488_v23 = vadd.f32 %v808_v55, %v452_v21  ;;  %v496_v24 = vadd.f32 %v808_v55, %v460_v22 }
  0xef   : > { %520 = vst [vmem:[%s819_s17 + $0xb8] sm:$0xff] %v488_v23 }
  0xf0   : > { %528 = vst [vmem:[%s819_s17 + $0xf8] sm:$0xff] %v496_v24 }
  0xf1 PF: > { %s15_s18 = sadd.s32 1, %s661_s18  }
  0xf2   : > { %p12_p4 = scmp.ge.s32.totalorder %s15_s18, 10  }
  0xf4   :  { %14 = sbr.rel (!%p12_p4) target bundleno = 1 (0x1), region = 70 }

// kernel: encoder_forward.4
= control target key start
LH: loop header
LB: loop body
LE: loop exit
PB: predicated region body
PF: predicated region fallthrough
CT: control target
= control target key end

     0   :  { %s1133_s18 = smov 0   ;;  %s1629_s0 = inlined_call_operand.vmem [shape: f32[512,512], index: 0, kind: input, shape index: {}]   ;;  %s1630_s1 = inlined_call_operand.vmem [shape: f32[512,128], index: 1, kind: input, shape index: {}]   ;;  %s1631_s2 = inlined_call_operand.vmem [shape: f32[1,128], index: 2, kind: input, shape index: {}]   ;;  %s1632_s3 = inlined_call_operand.vmem [shape: f32[1,128], index: 3, kind: input, shape index: {}]   ;;  %s1633_s4 = inlined_call_operand.vmem [shape: f32[1,128], index: 4, kind: input, shape index: {}]   ;;  %s1634_s5 = inlined_call_operand.vmem [shape: f32[512,128], index: 5, kind: output, shape index: {}]  }
   0x1 LB: > { %s1071_s19 = sadd.s32 4294967295, %s1101_s18   ;;  %p1075_p0 = scmp.ge.s32.totalorder %s1101_s18, 1  ;;  %s1101_s18 = sphi %s1133_s18, %s15_s18  }
   0x2   : > { %p189_p1 = scmp.lt.s32.totalorder %s1101_s18, 3 }
   0x4   : > { %p190_p2 = pnand %p1075_p0, %p189_p1 }
   0x5   : > { %s1233_s9 = sshll.u32 (!%p190_p2), %s1071_s19, 5 }
   0x6   : > { %193 = sbr.rel (%p190_p2) target bundleno = 435 (0x1b3), region = 40  ;;  %p219_p3 = scmp.lt.s32.totalorder (!%p190_p2), %s1233_s9, 63 }
   0xb   : > { %v406_v0 = vld [vmem:[%s1630_s1 + $0x178] sm:$0xff]  ;;  %v405_v2 = vld [vmem:[%s1630_s1 + $0x170] sm:$0xff]  ;;  %v404_v6 = vld [vmem:[%s1630_s1 + $0x168] sm:$0xff]  ;;  %s1636_s9 = smov (!%p219_p3, %s1233_s9), 63 }
   0xc   : > { %v374_v1 = vld [vmem:[%s1630_s1 + $0x78] sm:$0xff]  ;;  %653 = vmatpush.msra.mxu2 %v406_v0  ;;  %v373_v4 = vld [vmem:[%s1630_s1 + $0x70] sm:$0xff]  ;;  %v372_v8 = vld [vmem:[%s1630_s1 + $0x68] sm:$0xff]  ;;  %s1083_s7 = sshll.u32 %s1636_s9, 5  ;;  %s1080_s19 = sshll.u32 %s1636_s9, 3 }
   0xd   : > { %427 = vmatpush.msra.mxu0 %v374_v1  ;;  %v422_v3 = vld [vmem:[%s1630_s1 + $0x1f8] sm:$0xff]  ;;  %v421_v7 = vld [vmem:[%s1630_s1 + $0x1f0] sm:$0xff]  ;;  %v420_v10 = vld [vmem:[%s1630_s1 + $0x1e8] sm:$0xff]  ;;  %s1332_s26 = scalar_lea.vmem %s1629_s0, %s1083_s7  ;;  %s1443_s9 = scalar_lea.vmem %s1634_s5, %s1080_s19 }
   0xe   : > { %v390_v5 = vld [vmem:[%s1630_s1 + $0xf8] sm:$0xff]  ;;  %766 = vmatpush.msra.mxu3 %v422_v3  ;;  %654 = vmatpush.msra.mxu2 %v405_v2  ;;  %v389_v9 = vld [vmem:[%s1630_s1 + $0xf0] sm:$0xff]  ;;  %v403_v11 = vld [vmem:[%s1630_s1 + $0x160] sm:$0xff] }
   0xf   : > { %540 = vmatpush.msra.mxu1 %v390_v5  ;;  %428 = vmatpush.msra.mxu0 %v373_v4  ;;  %v371_v12 = vld [vmem:[%s1630_s1 + $0x60] sm:$0xff]  ;;  %v388_v13 = vld [vmem:[%s1630_s1 + $0xe8] sm:$0xff]  ;;  %v402_v16 = vld [vmem:[%s1630_s1 + $0x158] sm:$0xff] }
  0x10   : > { %767 = vmatpush.msra.mxu3 %v421_v7  ;;  %655 = vmatpush.msra.mxu2 %v404_v6  ;;  %v419_v14 = vld [vmem:[%s1630_s1 + $0x1e0] sm:$0xff]  ;;  %v370_v17 = vld [vmem:[%s1630_s1 + $0x58] sm:$0xff]  ;;  %v401_v20 = vld [vmem:[%s1630_s1 + $0x150] sm:$0xff] }
  0x11   : > { %541 = vmatpush.msra.mxu1 %v389_v9  ;;  %429 = vmatpush.msra.mxu0 %v372_v8  ;;  %v387_v15 = vld [vmem:[%s1630_s1 + $0xe0] sm:$0xff]  ;;  %v418_v18 = vld [vmem:[%s1630_s1 + $0x1d8] sm:$0xff]  ;;  %v369_v21 = vld [vmem:[%s1630_s1 + $0x50] sm:$0xff] }
  0x12   : > { %768 = vmatpush.msra.mxu3 %v420_v10  ;;  %656 = vmatpush.msra.mxu2 %v403_v11  ;;  %v386_v19 = vld [vmem:[%s1630_s1 + $0xd8] sm:$0xff]  ;;  %v417_v22 = vld [vmem:[%s1630_s1 + $0x1d0] sm:$0xff]  ;;  %v400_v24 = vld [vmem:[%s1630_s1 + $0x148] sm:$0xff] }
  0x13   : > { %542 = vmatpush.msra.mxu1 %v388_v13  ;;  %430 = vmatpush.msra.mxu0 %v371_v12  ;;  %v385_v23 = vld [vmem:[%s1630_s1 + $0xd0] sm:$0xff]  ;;  %v368_v25 = vld [vmem:[%s1630_s1 + $0x48] sm:$0xff]  ;;  %v399_v28 = vld [vmem:[%s1630_s1 + $0x140] sm:$0xff] }
  0x14   : > { %769 = vmatpush.msra.mxu3 %v419_v14  ;;  %657 = vmatpush.msra.mxu2 %v402_v16  ;;  %v416_v26 = vld [vmem:[%s1630_s1 + $0x1c8] sm:$0xff]  ;;  %v367_v29 = vld [vmem:[%s1630_s1 + $0x40] sm:$0xff]  ;;  %v398_v32 = vld [vmem:[%s1630_s1 + $0x138] sm:$0xff] }
  0x15   : > { %543 = vmatpush.msra.mxu1 %v387_v15  ;;  %431 = vmatpush.msra.mxu0 %v370_v17  ;;  %v384_v27 = vld [vmem:[%s1630_s1 + $0xc8] sm:$0xff]  ;;  %v415_v30 = vld [vmem:[%s1630_s1 + $0x1c0] sm:$0xff]  ;;  %v366_v33 = vld [vmem:[%s1630_s1 + $0x38] sm:$0xff] }
  0x16   : > { %770 = vmatpush.msra.mxu3 %v418_v18  ;;  %658 = vmatpush.msra.mxu2 %v401_v20  ;;  %v383_v31 = vld [vmem:[%s1630_s1 + $0xc0] sm:$0xff]  ;;  %v414_v34 = vld [vmem:[%s1630_s1 + $0x1b8] sm:$0xff]  ;;  %v397_v36 = vld [vmem:[%s1630_s1 + $0x130] sm:$0xff] }
  0x17   : > { %544 = vmatpush.msra.mxu1 %v386_v19  ;;  %432 = vmatpush.msra.mxu0 %v369_v21  ;;  %v382_v35 = vld [vmem:[%s1630_s1 + $0xb8] sm:$0xff]  ;;  %v365_v37 = vld [vmem:[%s1630_s1 + $0x30] sm:$0xff]  ;;  %v396_v40 = vld [vmem:[%s1630_s1 + $0x128] sm:$0xff] }
  0x18   : > { %771 = vmatpush.msra.mxu3 %v417_v22  ;;  %659 = vmatpush.msra.mxu2 %v400_v24  ;;  %v413_v38 = vld [vmem:[%s1630_s1 + $0x1b0] sm:$0xff]  ;;  %v364_v41 = vld [vmem:[%s1630_s1 + $0x28] sm:$0xff]  ;;  %v395_v44 = vld [vmem:[%s1630_s1 + $0x120] sm:$0xff] }
  0x19   : > { %545 = vmatpush.msra.mxu1 %v385_v23  ;;  %433 = vmatpush.msra.mxu0 %v368_v25  ;;  %v381_v39 = vld [vmem:[%s1630_s1 + $0xb0] sm:$0xff]  ;;  %v412_v42 = vld [vmem:[%s1630_s1 + $0x1a8] sm:$0xff]  ;;  %v363_v45 = vld [vmem:[%s1630_s1 + $0x20] sm:$0xff] }
  0x1a   : > { %772 = vmatpush.msra.mxu3 %v416_v26  ;;  %660 = vmatpush.msra.mxu2 %v399_v28  ;;  %v380_v43 = vld [vmem:[%s1630_s1 + $0xa8] sm:$0xff]  ;;  %v411_v46 = vld [vmem:[%s1630_s1 + $0x1a0] sm:$0xff]  ;;  %v394_v48 = vld [vmem:[%s1630_s1 + $0x118] sm:$0xff] }
  0x1b   : > { %546 = vmatpush.msra.mxu1 %v384_v27  ;;  %434 = vmatpush.msra.mxu0 %v367_v29  ;;  %v379_v47 = vld [vmem:[%s1630_s1 + $0xa0] sm:$0xff]  ;;  %v362_v49 = vld [vmem:[%s1630_s1 + $0x18] sm:$0xff]  ;;  %v393_v52 = vld [vmem:[%s1630_s1 + $0x110] sm:$0xff] }
  0x1c   : > { %773 = vmatpush.msra.mxu3 %v415_v30  ;;  %661 = vmatpush.msra.mxu2 %v398_v32  ;;  %v410_v50 = vld [vmem:[%s1630_s1 + $0x198] sm:$0xff]  ;;  %v361_v53 = vld [vmem:[%s1630_s1 + $0x10] sm:$0xff]  ;;  %v392_v54 = vld [vmem:[%s1630_s1 + $0x108] sm:$0xff] }
  0x1d   : > { %547 = vmatpush.msra.mxu1 %v383_v31  ;;  %435 = vmatpush.msra.mxu0 %v366_v33  ;;  %v378_v51 = vld [vmem:[%s1630_s1 + $0x98] sm:$0xff]  ;;  %v409_v55 = vld [vmem:[%s1630_s1 + $0x190] sm:$0xff]  ;;  %v360_v57 = vld [vmem:[%s1630_s1 + $0x8] sm:$0xff] }
  0x1e   : > { %774 = vmatpush.msra.mxu3 %v414_v34  ;;  %662 = vmatpush.msra.mxu2 %v397_v36  ;;  %v377_v56 = vld [vmem:[%s1630_s1 + $0x90] sm:$0xff]  ;;  %v408_v58 = vld [vmem:[%s1630_s1 + $0x188] sm:$0xff]  ;;  %v391_v60 = vld [vmem:[%s1630_s1 + $0x100] sm:$0xff] }
  0x1f   : > { %548 = vmatpush.msra.mxu1 %v382_v35  ;;  %436 = vmatpush.msra.mxu0 %v365_v37  ;;  %v376_v59 = vld [vmem:[%s1630_s1 + $0x88] sm:$0xff]  ;;  %v359_v61 = vld [vmem:[%s1630_s1] sm:$0xff]  ;;  %v233_v62 = vld [vmem:[%s1332_s26 + $0x10] sm:$0xff] }
  0x20   : > { %775 = vmatpush.msra.mxu3 %v413_v38  ;;  %663 = vmatpush.msra.mxu2 %v396_v40  ;;  %v407_v63 = vld [vmem:[%s1630_s1 + $0x180] sm:$0xff]  ;;  %v234_v1 = vld [vmem:[%s1332_s26 + $0x18] sm:$0xff]  ;;  %v232_v3 = vld [vmem:[%s1332_s26 + $0x8] sm:$0xff] }
  0x21   : > { %549 = vmatpush.msra.mxu1 %v381_v39  ;;  %437 = vmatpush.msra.mxu0 %v364_v41  ;;  %v231_v0 = vld [vmem:[%s1332_s26] sm:$0xff]  ;;  %v237_v4 = vld [vmem:[%s1332_s26 + $0x30] sm:$0xff]  ;;  %v238_v6 = vld [vmem:[%s1332_s26 + $0x38] sm:$0xff] }
  0x22   : > { %776 = vmatpush.msra.mxu3 %v412_v42  ;;  %664 = vmatpush.msra.mxu2 %v395_v44  ;;  %v375_v2 = vld [vmem:[%s1630_s1 + $0x80] sm:$0xff]  ;;  %v236_v7 = vld [vmem:[%s1332_s26 + $0x28] sm:$0xff]  ;;  %v241_v8 = vld [vmem:[%s1332_s26 + $0x50] sm:$0xff] }
  0x23   : > { %550 = vmatpush.msra.mxu1 %v380_v43  ;;  %438 = vmatpush.msra.mxu0 %v363_v45  ;;  %v235_v5 = vld [vmem:[%s1332_s26 + $0x20] sm:$0xff]  ;;  %v242_v10 = vld [vmem:[%s1332_s26 + $0x58] sm:$0xff]  ;;  %v240_v11 = vld [vmem:[%s1332_s26 + $0x48] sm:$0xff] }
  0x24   : > { %777 = vmatpush.msra.mxu3 %v411_v46  ;;  %665 = vmatpush.msra.mxu2 %v394_v48  ;;  %v239_v9 = vld [vmem:[%s1332_s26 + $0x40] sm:$0xff]  ;;  %v245_v12 = vld [vmem:[%s1332_s26 + $0x70] sm:$0xff]  ;;  %v246_v14 = vld [vmem:[%s1332_s26 + $0x78] sm:$0xff] }
  0x25   : > { %551 = vmatpush.msra.mxu1 %v379_v47  ;;  %439 = vmatpush.msra.mxu0 %v362_v49  ;;  %v243_v13 = vld [vmem:[%s1332_s26 + $0x60] sm:$0xff]  ;;  %v244_v15 = vld [vmem:[%s1332_s26 + $0x68] sm:$0xff]  ;;  %v249_v16 = vld [vmem:[%s1332_s26 + $0x90] sm:$0xff] }
  0x26   : > { %778 = vmatpush.msra.mxu3 %v410_v50  ;;  %666 = vmatpush.msra.mxu2 %v393_v52  ;;  %v247_v17 = vld [vmem:[%s1332_s26 + $0x80] sm:$0xff]  ;;  %v250_v18 = vld [vmem:[%s1332_s26 + $0x98] sm:$0xff]  ;;  %v248_v19 = vld [vmem:[%s1332_s26 + $0x88] sm:$0xff] }
  0x27   : > { %552 = vmatpush.msra.mxu1 %v378_v51  ;;  %440 = vmatpush.msra.mxu0 %v361_v53  ;;  %v253_v20 = vld [vmem:[%s1332_s26 + $0xb0] sm:$0xff]  ;;  %v251_v21 = vld [vmem:[%s1332_s26 + $0xa0] sm:$0xff]  ;;  %v254_v22 = vld [vmem:[%s1332_s26 + $0xb8] sm:$0xff] }
  0x28   : > { %779 = vmatpush.msra.mxu3 %v409_v55  ;;  %667 = vmatpush.msra.mxu2 %v392_v54  ;;  %v252_v23 = vld [vmem:[%s1332_s26 + $0xa8] sm:$0xff]  ;;  %v257_v24 = vld [vmem:[%s1332_s26 + $0xd0] sm:$0xff]  ;;  %v255_v25 = vld [vmem:[%s1332_s26 + $0xc0] sm:$0xff] }
  0x29   : > { %553 = vmatpush.msra.mxu1 %v377_v56  ;;  %441 = vmatpush.msra.mxu0 %v360_v57  ;;  %v258_v26 = vld [vmem:[%s1332_s26 + $0xd8] sm:$0xff]  ;;  %v256_v27 = vld [vmem:[%s1332_s26 + $0xc8] sm:$0xff]  ;;  %v261_v28 = vld [vmem:[%s1332_s26 + $0xf0] sm:$0xff] }
  0x2a   : > { %780 = vmatpush.msra.mxu3 %v408_v58  ;;  %668 = vmatpush.msra.mxu2 %v391_v60  ;;  %v259_v29 = vld [vmem:[%s1332_s26 + $0xe0] sm:$0xff]  ;;  %v262_v30 = vld [vmem:[%s1332_s26 + $0xf8] sm:$0xff]  ;;  %v260_v31 = vld [vmem:[%s1332_s26 + $0xe8] sm:$0xff] }
  0x2b   : > { %554 = vmatpush.msra.mxu1 %v376_v59  ;;  %442 = vmatpush.msra.mxu0 %v359_v61  ;;  %v265_v32 = vld [vmem:[%s1332_s26 + $0x110] sm:$0xff]  ;;  %v263_v33 = vld [vmem:[%s1332_s26 + $0x100] sm:$0xff]  ;;  %v266_v34 = vld [vmem:[%s1332_s26 + $0x118] sm:$0xff] }
  0x2c   : > { %669 = vmatmul.f32.vlgmr.msra.gmra.mxu2 %v233_v62  ;;  %781 = vmatpush.msra.mxu3 %v407_v63  ;;  %v264_v35 = vld [vmem:[%s1332_s26 + $0x108] sm:$0xff]  ;;  %v269_v36 = vld [vmem:[%s1332_s26 + $0x130] sm:$0xff]  ;;  %v267_v37 = vld [vmem:[%s1332_s26 + $0x120] sm:$0xff] }
  0x2d   : > { %443 = vmatmul.f32.vlgmr.msra.gmra.mxu0 %v231_v0  ;;  %782 = vmatmul.f32.vlgmr.msra.gmra.mxu3 %v234_v1  ;;  %v270_v38 = vld [vmem:[%s1332_s26 + $0x138] sm:$0xff]  ;;  %v268_v39 = vld [vmem:[%s1332_s26 + $0x128] sm:$0xff]  ;;  %v273_v40 = vld [vmem:[%s1332_s26 + $0x150] sm:$0xff] }
  0x2e   : > { %555 = vmatpush.msra.mxu1 %v375_v2  ;;  %v271_v41 = vld [vmem:[%s1332_s26 + $0x140] sm:$0xff]  ;;  %v274_v42 = vld [vmem:[%s1332_s26 + $0x158] sm:$0xff]  ;;  %v272_v43 = vld [vmem:[%s1332_s26 + $0x148] sm:$0xff] }
  0x2f   : > { %556 = vmatmul.f32.vlgmr.msra.gmra.mxu1 %v232_v3  ;;  %v277_v44 = vld [vmem:[%s1332_s26 + $0x170] sm:$0xff]  ;;  %v275_v45 = vld [vmem:[%s1332_s26 + $0x160] sm:$0xff]  ;;  %v278_v46 = vld [vmem:[%s1332_s26 + $0x178] sm:$0xff] }
  0x30   : > { %v276_v47 = vld [vmem:[%s1332_s26 + $0x168] sm:$0xff]  ;;  %v281_v48 = vld [vmem:[%s1332_s26 + $0x190] sm:$0xff]  ;;  %v279_v49 = vld [vmem:[%s1332_s26 + $0x180] sm:$0xff] }
  0x31   : > { %v282_v50 = vld [vmem:[%s1332_s26 + $0x198] sm:$0xff]  ;;  %v280_v51 = vld [vmem:[%s1332_s26 + $0x188] sm:$0xff]  ;;  %v285_v52 = vld [vmem:[%s1332_s26 + $0x1b0] sm:$0xff] }
  0x32   : > { %v283_v53 = vld [vmem:[%s1332_s26 + $0x1a0] sm:$0xff]  ;;  %v286_v54 = vld [vmem:[%s1332_s26 + $0x1b8] sm:$0xff]  ;;  %v284_v55 = vld [vmem:[%s1332_s26 + $0x1a8] sm:$0xff] }
  0x33   : > { %v289_v56 = vld [vmem:[%s1332_s26 + $0x1d0] sm:$0xff]  ;;  %v287_v57 = vld [vmem:[%s1332_s26 + $0x1c0] sm:$0xff]  ;;  %v290_v58 = vld [vmem:[%s1332_s26 + $0x1d8] sm:$0xff] }
  0x34   : > { %672 = vmatmul.f32.gmra.mxu2 %v237_v4  ;;  %v288_v59 = vld [vmem:[%s1332_s26 + $0x1c8] sm:$0xff]  ;;  %v293_v60 = vld [vmem:[%s1332_s26 + $0x1f0] sm:$0xff]  ;;  %v291_v61 = vld [vmem:[%s1332_s26 + $0x1e0] sm:$0xff] }
  0x35   : > { %446 = vmatmul.f32.gmra.mxu0 %v235_v5  ;;  %785 = vmatmul.f32.gmra.mxu3 %v238_v6  ;;  %v294_v62 = vld [vmem:[%s1332_s26 + $0x1f8] sm:$0xff]  ;;  %v292_v63 = vld [vmem:[%s1332_s26 + $0x1e8] sm:$0xff]  ;;  %v1416_v0 = vld [vmem:[%s1631_s2] ss:$0 sm:$0xff] }
  0x36   : > { %v297_v1 = vld [vmem:[%s1332_s26 + $0x210] sm:$0xff]  ;;  %v295_v3 = vld [vmem:[%s1332_s26 + $0x200] sm:$0xff]  ;;  %v298_v4 = vld [vmem:[%s1332_s26 + $0x218] sm:$0xff] }
  0x37   : > { %559 = vmatmul.f32.gmra.mxu1 %v236_v7  ;;  %v296_v7 = vld [vmem:[%s1332_s26 + $0x208] sm:$0xff] }
  0x3c   : > { %675 = vmatmul.f32.gmra.mxu2 %v241_v8 }
  0x3d   : > { %449 = vmatmul.f32.gmra.mxu0 %v239_v9  ;;  %788 = vmatmul.f32.gmra.mxu3 %v242_v10 }
  0x3f   : > { %562 = vmatmul.f32.gmra.mxu1 %v240_v11 }
  0x44   : > { %678 = vmatmul.f32.gmra.mxu2 %v245_v12  ;;  %v301_v12 = vld [vmem:[%s1332_s26 + $0x230] sm:$0xff] }
  0x45   : > { %452 = vmatmul.f32.gmra.mxu0 %v243_v13  ;;  %791 = vmatmul.f32.gmra.mxu3 %v246_v14  ;;  %v1427_v14 = vld [vmem:[%s1632_s3] ss:$0 sm:$0xff] }
  0x47   : > { %565 = vmatmul.f32.gmra.mxu1 %v244_v15 }
  0x4c   : > { %681 = vmatmul.f32.gmra.mxu2 %v249_v16  ;;  %v299_v16 = vld [vmem:[%s1332_s26 + $0x220] sm:$0xff] }
  0x4d   : > { %455 = vmatmul.f32.gmra.mxu0 %v247_v17  ;;  %794 = vmatmul.f32.gmra.mxu3 %v250_v18  ;;  %v302_v17 = vld [vmem:[%s1332_s26 + $0x238] sm:$0xff] }
  0x4f   : > { %568 = vmatmul.f32.gmra.mxu1 %v248_v19 }
  0x54   : > { %684 = vmatmul.f32.gmra.mxu2 %v253_v20  ;;  %v1436_v20 = vld [vmem:[%s1633_s4] ss:$0 sm:$0xff] }
  0x55   : > { %458 = vmatmul.f32.gmra.mxu0 %v251_v21  ;;  %797 = vmatmul.f32.gmra.mxu3 %v254_v22  ;;  %v300_v22 = vld [vmem:[%s1332_s26 + $0x228] sm:$0xff] }
  0x57   : > { %571 = vmatmul.f32.gmra.mxu1 %v252_v23 }
  0x5c   : > { %687 = vmatmul.f32.gmra.mxu2 %v257_v24 }
  0x5d   : > { %461 = vmatmul.f32.gmra.mxu0 %v255_v25  ;;  %800 = vmatmul.f32.gmra.mxu3 %v258_v26 }
  0x5f   : > { %574 = vmatmul.f32.gmra.mxu1 %v256_v27 }
  0x64   : > { %690 = vmatmul.f32.gmra.mxu2 %v261_v28 }
  0x65   : > { %464 = vmatmul.f32.gmra.mxu0 %v259_v29  ;;  %803 = vmatmul.f32.gmra.mxu3 %v262_v30  ;;  %v305_v29 = vld [vmem:[%s1332_s26 + $0x250] sm:$0xff] }
  0x67   : > { %577 = vmatmul.f32.gmra.mxu1 %v260_v31 }
  0x6c   : > { %693 = vmatmul.f32.gmra.mxu2 %v265_v32  ;;  %v303_v32 = vld [vmem:[%s1332_s26 + $0x240] sm:$0xff] }
  0x6d   : > { %467 = vmatmul.f32.gmra.mxu0 %v263_v33  ;;  %806 = vmatmul.f32.gmra.mxu3 %v266_v34  ;;  %v306_v33 = vld [vmem:[%s1332_s26 + $0x258] sm:$0xff] }
  0x6f   : > { %580 = vmatmul.f32.gmra.mxu1 %v264_v35 }
  0x74   : > { %696 = vmatmul.f32.gmra.mxu2 %v269_v36 }
  0x75   : > { %470 = vmatmul.f32.gmra.mxu0 %v267_v37  ;;  %809 = vmatmul.f32.gmra.mxu3 %v270_v38  ;;  %v304_v37 = vld [vmem:[%s1332_s26 + $0x248] sm:$0xff] }
  0x77   : > { %583 = vmatmul.f32.gmra.mxu1 %v268_v39 }
  0x7c   : > { %699 = vmatmul.f32.gmra.mxu2 %v273_v40 }
  0x7d   : > { %473 = vmatmul.f32.gmra.mxu0 %v271_v41  ;;  %812 = vmatmul.f32.gmra.mxu3 %v274_v42 }
  0x7f   : > { %586 = vmatmul.f32.gmra.mxu1 %v272_v43 }
  0x84   : > { %702 = vmatmul.f32.gmra.mxu2 %v277_v44  ;;  %v309_v44 = vld [vmem:[%s1332_s26 + $0x270] sm:$0xff] }
  0x85   : > { %476 = vmatmul.f32.gmra.mxu0 %v275_v45  ;;  %815 = vmatmul.f32.gmra.mxu3 %v278_v46 }
  0x87   : > { %589 = vmatmul.f32.gmra.mxu1 %v276_v47  ;;  %v307_v47 = vld [vmem:[%s1332_s26 + $0x260] sm:$0xff] }
  0x8c   : > { %705 = vmatmul.f32.gmra.mxu2 %v281_v48  ;;  %v310_v48 = vld [vmem:[%s1332_s26 + $0x278] sm:$0xff] }
  0x8d   : > { %479 = vmatmul.f32.gmra.mxu0 %v279_v49  ;;  %818 = vmatmul.f32.gmra.mxu3 %v282_v50 }
  0x8f   : > { %592 = vmatmul.f32.gmra.mxu1 %v280_v51 }
  0x94   : > { %708 = vmatmul.f32.gmra.mxu2 %v285_v52  ;;  %v308_v52 = vld [vmem:[%s1332_s26 + $0x268] sm:$0xff] }
  0x95   : > { %482 = vmatmul.f32.gmra.mxu0 %v283_v53  ;;  %821 = vmatmul.f32.gmra.mxu3 %v286_v54 }
  0x97   : > { %595 = vmatmul.f32.gmra.mxu1 %v284_v55 }
  0x9c   : > { %711 = vmatmul.f32.gmra.mxu2 %v289_v56 }
  0x9d   : > { %485 = vmatmul.f32.gmra.mxu0 %v287_v57  ;;  %824 = vmatmul.f32.gmra.mxu3 %v290_v58 }
  0x9f   : > { %598 = vmatmul.f32.gmra.mxu1 %v288_v59  ;;  %v313_v59 = vld [vmem:[%s1332_s26 + $0x290] sm:$0xff] }
  0xa4   : > { %714 = vmatmul.f32.gmra.mxu2 %v293_v60 }
  0xa5   : > { %488 = vmatmul.f32.gmra.mxu0 %v291_v61  ;;  %827 = vmatmul.f32.gmra.mxu3 %v294_v62  ;;  %v311_v62 = vld [vmem:[%s1332_s26 + $0x280] sm:$0xff] }
  0xa7   : > { %601 = vmatmul.f32.gmra.mxu1 %v292_v63  ;;  %v314_v63 = vld [vmem:[%s1332_s26 + $0x298] sm:$0xff] }
  0xaa   : > { %v444_v2 = vpop.f32.mrf.mxu0 }
  0xab   : > { %v445_v5 = vadd.f32 %v1416_v0, %v444_v2 }
  0xac   : > { %717 = vmatmul.f32.gmra.mxu2 %v297_v1  ;;  %v557_v6 = vpop.f32.mrf.mxu1 }
  0xad   : > { %v558_v8 = vadd.f32 %v557_v6, %v445_v5  ;;  %491 = vmatmul.f32.gmra.mxu0 %v295_v3  ;;  %830 = vmatmul.f32.gmra.mxu3 %v298_v4  ;;  %v312_v4 = vld [vmem:[%s1332_s26 + $0x288] sm:$0xff] }
  0xaf   : > { %v670_v9 = vpop.f32.mrf.mxu2  ;;  %604 = vmatmul.f32.gmra.mxu1 %v296_v7 }
  0xb0   : > { %v671_v10 = vadd.f32 %v670_v9, %v558_v8  ;;  %v783_v11 = vpop.f32.mrf.mxu3 }
  0xb2   : > { %v784_v13 = vadd.f32 %v783_v11, %v671_v10  ;;  %v447_v15 = vpop.f32.mrf.mxu0  ;;  %v317_v11 = vld [vmem:[%s1332_s26 + $0x2b0] sm:$0xff] }
  0xb3   : > { %v448_v18 = vadd.f32 %v1416_v0, %v447_v15  ;;  %v315_v15 = vld [vmem:[%s1332_s26 + $0x2a0] sm:$0xff] }
  0xb4   : > { %v879_v19 = vmax.f32 %v784_v13, 0.0  ;;  %720 = vmatmul.f32.gmra.mxu2 %v301_v12  ;;  %v560_v21 = vpop.f32.mrf.mxu1 }
  0xb5   : > { %v561_v23 = vadd.f32 %v560_v21, %v448_v18  ;;  %494 = vmatmul.f32.gmra.mxu0 %v299_v16  ;;  %833 = vmatmul.f32.gmra.mxu3 %v302_v17  ;;  %v318_v16 = vld [vmem:[%s1332_s26 + $0x2b8] sm:$0xff]  ;;  %v316_v21 = vld [vmem:[%s1332_s26 + $0x2a8] sm:$0xff] }
  0xb6   : > { %v915_v24 = vmul.f32 %v1427_v14, %v879_v19 }
  0xb7   : > { %v673_v25 = vpop.f32.mrf.mxu2  ;;  %607 = vmatmul.f32.gmra.mxu1 %v300_v22 }
  0xb8   : > { %v951_v26 = vadd.f32 %v1436_v20, %v915_v24  ;;  %v674_v27 = vadd.f32 %v673_v25, %v561_v23  ;;  %v786_v28 = vpop.f32.mrf.mxu3 }
  0xba   : > { %983 = vst [vmem:[%s1443_s9] sm:$0xff] %v951_v26  ;;  %v787_v30 = vadd.f32 %v786_v28, %v674_v27  ;;  %v450_v31 = vpop.f32.mrf.mxu0  ;;  %v321_v28 = vld [vmem:[%s1332_s26 + $0x2d0] sm:$0xff] }
  0xbb   : > { %v451_v34 = vadd.f32 %v1416_v0, %v450_v31  ;;  %v319_v31 = vld [vmem:[%s1332_s26 + $0x2c0] sm:$0xff] }
  0xbc   : > { %v880_v35 = vmax.f32 %v787_v30, 0.0  ;;  %723 = vmatmul.f32.gmra.mxu2 %v305_v29  ;;  %v563_v36 = vpop.f32.mrf.mxu1 }
  0xbd   : > { %v564_v38 = vadd.f32 %v563_v36, %v451_v34  ;;  %497 = vmatmul.f32.gmra.mxu0 %v303_v32  ;;  %836 = vmatmul.f32.gmra.mxu3 %v306_v33  ;;  %v322_v32 = vld [vmem:[%s1332_s26 + $0x2d8] sm:$0xff]  ;;  %v320_v36 = vld [vmem:[%s1332_s26 + $0x2c8] sm:$0xff] }
  0xbe   : > { %v916_v39 = vmul.f32 %v1427_v14, %v880_v35 }
  0xbf   : > { %v676_v40 = vpop.f32.mrf.mxu2  ;;  %610 = vmatmul.f32.gmra.mxu1 %v304_v37 }
  0xc0   : > { %v952_v41 = vadd.f32 %v1436_v20, %v916_v39  ;;  %v677_v42 = vadd.f32 %v676_v40, %v564_v38  ;;  %v789_v43 = vpop.f32.mrf.mxu3 }
  0xc2   : > { %984 = vst [vmem:[%s1443_s9 + $0x8] sm:$0xff] %v952_v41  ;;  %v790_v45 = vadd.f32 %v789_v43, %v677_v42  ;;  %v453_v46 = vpop.f32.mrf.mxu0  ;;  %v325_v43 = vld [vmem:[%s1332_s26 + $0x2f0] sm:$0xff] }
  0xc3   : > { %v454_v49 = vadd.f32 %v1416_v0, %v453_v46  ;;  %v323_v46 = vld [vmem:[%s1332_s26 + $0x2e0] sm:$0xff] }
  0xc4   : > { %v881_v50 = vmax.f32 %v790_v45, 0.0  ;;  %726 = vmatmul.f32.gmra.mxu2 %v309_v44  ;;  %v566_v51 = vpop.f32.mrf.mxu1 }
  0xc5   : > { %v567_v53 = vadd.f32 %v566_v51, %v454_v49  ;;  %500 = vmatmul.f32.gmra.mxu0 %v307_v47  ;;  %839 = vmatmul.f32.gmra.mxu3 %v310_v48  ;;  %v326_v47 = vld [vmem:[%s1332_s26 + $0x2f8] sm:$0xff]  ;;  %v324_v51 = vld [vmem:[%s1332_s26 + $0x2e8] sm:$0xff] }
  0xc6   : > { %v917_v54 = vmul.f32 %v1427_v14, %v881_v50 }
  0xc7   : > { %v679_v55 = vpop.f32.mrf.mxu2  ;;  %613 = vmatmul.f32.gmra.mxu1 %v308_v52 }
  0xc8   : > { %v953_v56 = vadd.f32 %v1436_v20, %v917_v54  ;;  %v680_v57 = vadd.f32 %v679_v55, %v567_v53  ;;  %v792_v58 = vpop.f32.mrf.mxu3 }
  0xca   : > { %985 = vst [vmem:[%s1443_s9 + $0x10] sm:$0xff] %v953_v56  ;;  %v793_v60 = vadd.f32 %v792_v58, %v680_v57  ;;  %v456_v61 = vpop.f32.mrf.mxu0  ;;  %v329_v58 = vld [vmem:[%s1332_s26 + $0x310] sm:$0xff] }
  0xcb   : > { %v457_v1 = vadd.f32 %v1416_v0, %v456_v61  ;;  %v327_v61 = vld [vmem:[%s1332_s26 + $0x300] sm:$0xff] }
  0xcc   : > { %v882_v2 = vmax.f32 %v793_v60, 0.0  ;;  %729 = vmatmul.f32.gmra.mxu2 %v313_v59  ;;  %v569_v3 = vpop.f32.mrf.mxu1 }
  0xcd   : > { %v570_v5 = vadd.f32 %v569_v3, %v457_v1  ;;  %503 = vmatmul.f32.gmra.mxu0 %v311_v62  ;;  %842 = vmatmul.f32.gmra.mxu3 %v314_v63  ;;  %v330_v62 = vld [vmem:[%s1332_s26 + $0x318] sm:$0xff]  ;;  %v328_v3 = vld [vmem:[%s1332_s26 + $0x308] sm:$0xff] }
  0xce   : > { %v918_v6 = vmul.f32 %v1427_v14, %v882_v2 }
  0xcf   : > { %v682_v7 = vpop.f32.mrf.mxu2  ;;  %616 = vmatmul.f32.gmra.mxu1 %v312_v4 }
  0xd0   : > { %v954_v8 = vadd.f32 %v1436_v20, %v918_v6  ;;  %v683_v9 = vadd.f32 %v682_v7, %v570_v5  ;;  %v795_v10 = vpop.f32.mrf.mxu3 }
  0xd2   : > { %986 = vst [vmem:[%s1443_s9 + $0x18] sm:$0xff] %v954_v8  ;;  %v796_v12 = vadd.f32 %v795_v10, %v683_v9  ;;  %v459_v13 = vpop.f32.mrf.mxu0  ;;  %v333_v10 = vld [vmem:[%s1332_s26 + $0x330] sm:$0xff] }
  0xd3   : > { %v460_v17 = vadd.f32 %v1416_v0, %v459_v13  ;;  %v331_v13 = vld [vmem:[%s1332_s26 + $0x320] sm:$0xff] }
  0xd4   : > { %v883_v18 = vmax.f32 %v796_v12, 0.0  ;;  %732 = vmatmul.f32.gmra.mxu2 %v317_v11  ;;  %v572_v19 = vpop.f32.mrf.mxu1 }
  0xd5   : > { %v573_v22 = vadd.f32 %v572_v19, %v460_v17  ;;  %506 = vmatmul.f32.gmra.mxu0 %v315_v15  ;;  %845 = vmatmul.f32.gmra.mxu3 %v318_v16  ;;  %v334_v15 = vld [vmem:[%s1332_s26 + $0x338] sm:$0xff]  ;;  %v332_v19 = vld [vmem:[%s1332_s26 + $0x328] sm:$0xff] }
  0xd6   : > { %v919_v23 = vmul.f32 %v1427_v14, %v883_v18 }
  0xd7   : > { %v685_v24 = vpop.f32.mrf.mxu2  ;;  %619 = vmatmul.f32.gmra.mxu1 %v316_v21 }
  0xd8   : > { %v955_v25 = vadd.f32 %v1436_v20, %v919_v23  ;;  %v686_v26 = vadd.f32 %v685_v24, %v573_v22  ;;  %v798_v27 = vpop.f32.mrf.mxu3 }
  0xda   : > { %987 = vst [vmem:[%s1443_s9 + $0x20] sm:$0xff] %v955_v25  ;;  %v799_v29 = vadd.f32 %v798_v27, %v686_v26  ;;  %v462_v30 = vpop.f32.mrf.mxu0  ;;  %v337_v27 = vld [vmem:[%s1332_s26 + $0x350] sm:$0xff] }
  0xdb   : > { %v463_v33 = vadd.f32 %v1416_v0, %v462_v30  ;;  %v335_v30 = vld [vmem:[%s1332_s26 + $0x340] sm:$0xff] }
  0xdc   : > { %v884_v34 = vmax.f32 %v799_v29, 0.0  ;;  %735 = vmatmul.f32.gmra.mxu2 %v321_v28  ;;  %v575_v35 = vpop.f32.mrf.mxu1 }
  0xdd   : > { %v576_v37 = vadd.f32 %v575_v35, %v463_v33  ;;  %509 = vmatmul.f32.gmra.mxu0 %v319_v31  ;;  %848 = vmatmul.f32.gmra.mxu3 %v322_v32  ;;  %v338_v31 = vld [vmem:[%s1332_s26 + $0x358] sm:$0xff]  ;;  %v336_v35 = vld [vmem:[%s1332_s26 + $0x348] sm:$0xff] }
  0xde   : > { %v920_v38 = vmul.f32 %v1427_v14, %v884_v34 }
  0xdf   : > { %v688_v39 = vpop.f32.mrf.mxu2  ;;  %622 = vmatmul.f32.gmra.mxu1 %v320_v36 }
  0xe0   : > { %v956_v40 = vadd.f32 %v1436_v20, %v920_v38  ;;  %v689_v41 = vadd.f32 %v688_v39, %v576_v37  ;;  %v801_v42 = vpop.f32.mrf.mxu3 }
  0xe2   : > { %988 = vst [vmem:[%s1443_s9 + $0x28] sm:$0xff] %v956_v40  ;;  %v802_v44 = vadd.f32 %v801_v42, %v689_v41  ;;  %v465_v45 = vpop.f32.mrf.mxu0  ;;  %v341_v42 = vld [vmem:[%s1332_s26 + $0x370] sm:$0xff] }
  0xe3   : > { %v466_v48 = vadd.f32 %v1416_v0, %v465_v45  ;;  %v339_v45 = vld [vmem:[%s1332_s26 + $0x360] sm:$0xff] }
  0xe4   : > { %v885_v49 = vmax.f32 %v802_v44, 0.0  ;;  %738 = vmatmul.f32.gmra.mxu2 %v325_v43  ;;  %v578_v50 = vpop.f32.mrf.mxu1 }
  0xe5   : > { %v579_v52 = vadd.f32 %v578_v50, %v466_v48  ;;  %512 = vmatmul.f32.gmra.mxu0 %v323_v46  ;;  %851 = vmatmul.f32.gmra.mxu3 %v326_v47  ;;  %v342_v46 = vld [vmem:[%s1332_s26 + $0x378] sm:$0xff]  ;;  %v340_v50 = vld [vmem:[%s1332_s26 + $0x368] sm:$0xff] }
  0xe6   : > { %v921_v53 = vmul.f32 %v1427_v14, %v885_v49 }
  0xe7   : > { %v691_v54 = vpop.f32.mrf.mxu2  ;;  %625 = vmatmul.f32.gmra.mxu1 %v324_v51 }
  0xe8   : > { %v957_v55 = vadd.f32 %v1436_v20, %v921_v53  ;;  %v692_v56 = vadd.f32 %v691_v54, %v579_v52  ;;  %v804_v57 = vpop.f32.mrf.mxu3 }
  0xea   : > { %989 = vst [vmem:[%s1443_s9 + $0x30] sm:$0xff] %v957_v55  ;;  %v805_v59 = vadd.f32 %v804_v57, %v692_v56  ;;  %v468_v60 = vpop.f32.mrf.mxu0  ;;  %v345_v57 = vld [vmem:[%s1332_s26 + $0x390] sm:$0xff] }
  0xeb   : > { %v469_v63 = vadd.f32 %v1416_v0, %v468_v60  ;;  %v343_v60 = vld [vmem:[%s1332_s26 + $0x380] sm:$0xff] }
  0xec   : > { %v886_v1 = vmax.f32 %v805_v59, 0.0  ;;  %741 = vmatmul.f32.gmra.mxu2 %v329_v58  ;;  %v581_v2 = vpop.f32.mrf.mxu1 }
  0xed   : > { %v582_v4 = vadd.f32 %v581_v2, %v469_v63  ;;  %515 = vmatmul.f32.gmra.mxu0 %v327_v61  ;;  %854 = vmatmul.f32.gmra.mxu3 %v330_v62  ;;  %v346_v61 = vld [vmem:[%s1332_s26 + $0x398] sm:$0xff]  ;;  %v344_v2 = vld [vmem:[%s1332_s26 + $0x388] sm:$0xff] }
  0xee   : > { %v922_v5 = vmul.f32 %v1427_v14, %v886_v1 }
  0xef   : > { %v694_v6 = vpop.f32.mrf.mxu2  ;;  %628 = vmatmul.f32.gmra.mxu1 %v328_v3 }
  0xf0   : > { %v958_v7 = vadd.f32 %v1436_v20, %v922_v5  ;;  %v695_v8 = vadd.f32 %v694_v6, %v582_v4  ;;  %v807_v9 = vpop.f32.mrf.mxu3 }
  0xf2   : > { %990 = vst [vmem:[%s1443_s9 + $0x38] sm:$0xff] %v958_v7  ;;  %v808_v11 = vadd.f32 %v807_v9, %v695_v8  ;;  %v471_v12 = vpop.f32.mrf.mxu0  ;;  %v349_v9 = vld [vmem:[%s1332_s26 + $0x3b0] sm:$0xff] }
  0xf3   : > { %v472_v16 = vadd.f32 %v1416_v0, %v471_v12  ;;  %v347_v12 = vld [vmem:[%s1332_s26 + $0x3a0] sm:$0xff] }
  0xf4   : > { %v887_v17 = vmax.f32 %v808_v11, 0.0  ;;  %744 = vmatmul.f32.gmra.mxu2 %v333_v10  ;;  %v584_v18 = vpop.f32.mrf.mxu1 }
  0xf5   : > { %v585_v21 = vadd.f32 %v584_v18, %v472_v16  ;;  %518 = vmatmul.f32.gmra.mxu0 %v331_v13  ;;  %857 = vmatmul.f32.gmra.mxu3 %v334_v15  ;;  %v350_v13 = vld [vmem:[%s1332_s26 + $0x3b8] sm:$0xff]  ;;  %v348_v18 = vld [vmem:[%s1332_s26 + $0x3a8] sm:$0xff] }
  0xf6   : > { %v923_v22 = vmul.f32 %v1427_v14, %v887_v17 }
  0xf7   : > { %v697_v23 = vpop.f32.mrf.mxu2  ;;  %631 = vmatmul.f32.gmra.mxu1 %v332_v19 }
  0xf8   : > { %v959_v24 = vadd.f32 %v1436_v20, %v923_v22  ;;  %v698_v25 = vadd.f32 %v697_v23, %v585_v21  ;;  %v810_v26 = vpop.f32.mrf.mxu3 }
  0xfa   : > { %991 = vst [vmem:[%s1443_s9 + $0x40] sm:$0xff] %v959_v24  ;;  %v811_v28 = vadd.f32 %v810_v26, %v698_v25  ;;  %v474_v29 = vpop.f32.mrf.mxu0  ;;  %v353_v26 = vld [vmem:[%s1332_s26 + $0x3d0] sm:$0xff] }
  0xfb   : > { %v475_v32 = vadd.f32 %v1416_v0, %v474_v29  ;;  %v351_v29 = vld [vmem:[%s1332_s26 + $0x3c0] sm:$0xff] }
  0xfc   : > { %v888_v33 = vmax.f32 %v811_v28, 0.0  ;;  %747 = vmatmul.f32.gmra.mxu2 %v337_v27  ;;  %v587_v34 = vpop.f32.mrf.mxu1 }
  0xfd   : > { %v588_v36 = vadd.f32 %v587_v34, %v475_v32  ;;  %521 = vmatmul.f32.gmra.mxu0 %v335_v30  ;;  %860 = vmatmul.f32.gmra.mxu3 %v338_v31  ;;  %v354_v30 = vld [vmem:[%s1332_s26 + $0x3d8] sm:$0xff]  ;;  %v352_v34 = vld [vmem:[%s1332_s26 + $0x3c8] sm:$0xff] }
  0xfe   : > { %v924_v37 = vmul.f32 %v1427_v14, %v888_v33 }
  0xff   : > { %v700_v38 = vpop.f32.mrf.mxu2  ;;  %634 = vmatmul.f32.gmra.mxu1 %v336_v35 }
 0x100   : > { %v960_v39 = vadd.f32 %v1436_v20, %v924_v37  ;;  %v701_v40 = vadd.f32 %v700_v38, %v588_v36  ;;  %v813_v41 = vpop.f32.mrf.mxu3 }
 0x102   : > { %992 = vst [vmem:[%s1443_s9 + $0x48] sm:$0xff] %v960_v39  ;;  %v814_v43 = vadd.f32 %v813_v41, %v701_v40  ;;  %v477_v44 = vpop.f32.mrf.mxu0  ;;  %v357_v41 = vld [vmem:[%s1332_s26 + $0x3f0] sm:$0xff] }
 0x103   : > { %v478_v47 = vadd.f32 %v1416_v0, %v477_v44  ;;  %v355_v44 = vld [vmem:[%s1332_s26 + $0x3e0] sm:$0xff] }
 0x104   : > { %v889_v48 = vmax.f32 %v814_v43, 0.0  ;;  %750 = vmatmul.f32.gmra.mxu2 %v341_v42  ;;  %v590_v49 = vpop.f32.mrf.mxu1 }
 0x105   : > { %v591_v51 = vadd.f32 %v590_v49, %v478_v47  ;;  %524 = vmatmul.f32.gmra.mxu0 %v339_v45  ;;  %863 = vmatmul.f32.gmra.mxu3 %v342_v46  ;;  %v358_v45 = vld [vmem:[%s1332_s26 + $0x3f8] sm:$0xff]  ;;  %v356_v49 = vld [vmem:[%s1332_s26 + $0x3e8] sm:$0xff] }
 0x106   : > { %v925_v52 = vmul.f32 %v1427_v14, %v889_v48 }
 0x107   : > { %v703_v53 = vpop.f32.mrf.mxu2  ;;  %637 = vmatmul.f32.gmra.mxu1 %v340_v50 }
 0x108   : > { %v961_v54 = vadd.f32 %v1436_v20, %v925_v52  ;;  %v704_v55 = vadd.f32 %v703_v53, %v591_v51  ;;  %v816_v56 = vpop.f32.mrf.mxu3 }
 0x10a   : > { %993 = vst [vmem:[%s1443_s9 + $0x50] sm:$0xff] %v961_v54  ;;  %v817_v58 = vadd.f32 %v816_v56, %v704_v55  ;;  %v480_v59 = vpop.f32.mrf.mxu0 }
 0x10b   : > { %v481_v62 = vadd.f32 %v1416_v0, %v480_v59 }
 0x10c   : > { %v890_v63 = vmax.f32 %v817_v58, 0.0  ;;  %753 = vmatmul.f32.gmra.mxu2 %v345_v57  ;;  %v593_v1 = vpop.f32.mrf.mxu1 }
 0x10d   : > { %v594_v3 = vadd.f32 %v593_v1, %v481_v62  ;;  %527 = vmatmul.f32.gmra.mxu0 %v343_v60  ;;  %866 = vmatmul.f32.gmra.mxu3 %v346_v61 }
 0x10e   : > { %v926_v4 = vmul.f32 %v1427_v14, %v890_v63 }
 0x10f   : > { %v706_v5 = vpop.f32.mrf.mxu2  ;;  %640 = vmatmul.f32.gmra.mxu1 %v344_v2 }
 0x110   : > { %v962_v6 = vadd.f32 %v1436_v20, %v926_v4  ;;  %v707_v7 = vadd.f32 %v706_v5, %v594_v3  ;;  %v819_v8 = vpop.f32.mrf.mxu3 }
 0x112   : > { %994 = vst [vmem:[%s1443_s9 + $0x58] sm:$0xff] %v962_v6  ;;  %v820_v10 = vadd.f32 %v819_v8, %v707_v7  ;;  %v483_v11 = vpop.f32.mrf.mxu0 }
 0x113   : > { %v484_v15 = vadd.f32 %v1416_v0, %v483_v11 }
 0x114   : > { %v891_v16 = vmax.f32 %v820_v10, 0.0  ;;  %756 = vmatmul.f32.gmra.mxu2 %v349_v9  ;;  %v596_v17 = vpop.f32.mrf.mxu1 }
 0x115   : > { %v597_v19 = vadd.f32 %v596_v17, %v484_v15  ;;  %530 = vmatmul.f32.gmra.mxu0 %v347_v12  ;;  %869 = vmatmul.f32.gmra.mxu3 %v350_v13 }
 0x116   : > { %v927_v21 = vmul.f32 %v1427_v14, %v891_v16 }
 0x117   : > { %v709_v22 = vpop.f32.mrf.mxu2  ;;  %643 = vmatmul.f32.gmra.mxu1 %v348_v18 }
 0x118   : > { %v963_v23 = vadd.f32 %v1436_v20, %v927_v21  ;;  %v710_v24 = vadd.f32 %v709_v22, %v597_v19  ;;  %v822_v25 = vpop.f32.mrf.mxu3 }
 0x11a   : > { %995 = vst [vmem:[%s1443_s9 + $0x60] sm:$0xff] %v963_v23  ;;  %v823_v27 = vadd.f32 %v822_v25, %v710_v24  ;;  %v486_v28 = vpop.f32.mrf.mxu0 }
 0x11b   : > { %v487_v31 = vadd.f32 %v1416_v0, %v486_v28 }
 0x11c   : > { %v892_v32 = vmax.f32 %v823_v27, 0.0  ;;  %759 = vmatmul.f32.gmra.mxu2 %v353_v26  ;;  %v599_v33 = vpop.f32.mrf.mxu1 }
 0x11d   : > { %v600_v35 = vadd.f32 %v599_v33, %v487_v31  ;;  %533 = vmatmul.f32.gmra.mxu0 %v351_v29  ;;  %872 = vmatmul.f32.gmra.mxu3 %v354_v30 }
 0x11e   : > { %v928_v36 = vmul.f32 %v1427_v14, %v892_v32 }
 0x11f   : > { %v712_v37 = vpop.f32.mrf.mxu2  ;;  %646 = vmatmul.f32.gmra.mxu1 %v352_v34 }
 0x120   : > { %v964_v38 = vadd.f32 %v1436_v20, %v928_v36  ;;  %v713_v39 = vadd.f32 %v712_v37, %v600_v35  ;;  %v825_v40 = vpop.f32.mrf.mxu3 }
 0x122   : > { %996 = vst [vmem:[%s1443_s9 + $0x68] sm:$0xff] %v964_v38  ;;  %v826_v42 = vadd.f32 %v825_v40, %v713_v39  ;;  %v489_v43 = vpop.f32.mrf.mxu0 }
 0x123   : > { %v490_v46 = vadd.f32 %v1416_v0, %v489_v43 }
 0x124   : > { %v893_v47 = vmax.f32 %v826_v42, 0.0  ;;  %762 = vmatmul.f32.gmra.mxu2 %v357_v41  ;;  %v602_v48 = vpop.f32.mrf.mxu1 }
 0x125   : > { %v603_v50 = vadd.f32 %v602_v48, %v490_v46  ;;  %536 = vmatmul.f32.gmra.mxu0 %v355_v44  ;;  %875 = vmatmul.f32.gmra.mxu3 %v358_v45 }
 0x126   : > { %v929_v51 = vmul.f32 %v1427_v14, %v893_v47 }
 0x127   : > { %v715_v52 = vpop.f32.mrf.mxu2  ;;  %649 = vmatmul.f32.gmra.mxu1 %v356_v49 }
 0x128   : > { %v965_v53 = vadd.f32 %v1436_v20, %v929_v51  ;;  %v716_v54 = vadd.f32 %v715_v52, %v603_v50  ;;  %v828_v55 = vpop.f32.mrf.mxu3 }
 0x12a   : > { %997 = vst [vmem:[%s1443_s9 + $0x70] sm:$0xff] %v965_v53  ;;  %v829_v56 = vadd.f32 %v828_v55, %v716_v54  ;;  %v492_v57 = vpop.f32.mrf.mxu0 }
 0x12b   : > { %v493_v58 = vadd.f32 %v1416_v0, %v492_v57 }
 0x12c   : > { %v894_v59 = vmax.f32 %v829_v56, 0.0  ;;  %v605_v60 = vpop.f32.mrf.mxu1 }
 0x12d   : > { %v606_v61 = vadd.f32 %v605_v60, %v493_v58 }
 0x12e   : > { %v930_v62 = vmul.f32 %v1427_v14, %v894_v59 }
 0x12f   : > { %v718_v63 = vpop.f32.mrf.mxu2 }
 0x130   : > { %v966_v1 = vadd.f32 %v1436_v20, %v930_v62  ;;  %v719_v2 = vadd.f32 %v718_v63, %v606_v61  ;;  %v831_v3 = vpop.f32.mrf.mxu3 }
 0x132   : > { %998 = vst [vmem:[%s1443_s9 + $0x78] sm:$0xff] %v966_v1  ;;  %v832_v4 = vadd.f32 %v831_v3, %v719_v2  ;;  %v495_v5 = vpop.f32.mrf.mxu0 }
 0x133   : > { %v496_v6 = vadd.f32 %v1416_v0, %v495_v5 }
 0x134   : > { %v895_v7 = vmax.f32 %v832_v4, 0.0  ;;  %v608_v8 = vpop.f32.mrf.mxu1 }
 0x135   : > { %v609_v9 = vadd.f32 %v608_v8, %v496_v6 }
 0x136   : > { %v931_v10 = vmul.f32 %v1427_v14, %v895_v7 }
 0x137   : > { %v721_v11 = vpop.f32.mrf.mxu2 }
 0x138   : > { %v967_v12 = vadd.f32 %v1436_v20, %v931_v10  ;;  %v722_v13 = vadd.f32 %v721_v11, %v609_v9  ;;  %v834_v15 = vpop.f32.mrf.mxu3 }
 0x13a   : > { %999 = vst [vmem:[%s1443_s9 + $0x80] sm:$0xff] %v967_v12  ;;  %v835_v16 = vadd.f32 %v834_v15, %v722_v13  ;;  %v498_v17 = vpop.f32.mrf.mxu0 }
 0x13b   : > { %v499_v18 = vadd.f32 %v1416_v0, %v498_v17 }
 0x13c   : > { %v896_v19 = vmax.f32 %v835_v16, 0.0  ;;  %v611_v21 = vpop.f32.mrf.mxu1 }
 0x13d   : > { %v612_v22 = vadd.f32 %v611_v21, %v499_v18 }
 0x13e   : > { %v932_v23 = vmul.f32 %v1427_v14, %v896_v19 }
 0x13f   : > { %v724_v24 = vpop.f32.mrf.mxu2 }
 0x140   : > { %v968_v25 = vadd.f32 %v1436_v20, %v932_v23  ;;  %v725_v26 = vadd.f32 %v724_v24, %v612_v22  ;;  %v837_v27 = vpop.f32.mrf.mxu3 }
 0x142   : > { %1000 = vst [vmem:[%s1443_s9 + $0x88] sm:$0xff] %v968_v25  ;;  %v838_v28 = vadd.f32 %v837_v27, %v725_v26  ;;  %v501_v29 = vpop.f32.mrf.mxu0 }
 0x143   : > { %v502_v30 = vadd.f32 %v1416_v0, %v501_v29 }
 0x144   : > { %v897_v31 = vmax.f32 %v838_v28, 0.0  ;;  %v614_v32 = vpop.f32.mrf.mxu1 }
 0x145   : > { %v615_v33 = vadd.f32 %v614_v32, %v502_v30 }
 0x146   : > { %v933_v34 = vmul.f32 %v1427_v14, %v897_v31 }
 0x147   : > { %v727_v35 = vpop.f32.mrf.mxu2 }
 0x148   : > { %v969_v36 = vadd.f32 %v1436_v20, %v933_v34  ;;  %v728_v37 = vadd.f32 %v727_v35, %v615_v33  ;;  %v840_v38 = vpop.f32.mrf.mxu3 }
 0x14a   : > { %1001 = vst [vmem:[%s1443_s9 + $0x90] sm:$0xff] %v969_v36  ;;  %v841_v39 = vadd.f32 %v840_v38, %v728_v37  ;;  %v504_v40 = vpop.f32.mrf.mxu0 }
 0x14b   : > { %v505_v41 = vadd.f32 %v1416_v0, %v504_v40 }
 0x14c   : > { %v898_v42 = vmax.f32 %v841_v39, 0.0  ;;  %v617_v43 = vpop.f32.mrf.mxu1 }
 0x14d   : > { %v618_v44 = vadd.f32 %v617_v43, %v505_v41 }
 0x14e   : > { %v934_v45 = vmul.f32 %v1427_v14, %v898_v42 }
 0x14f   : > { %v730_v46 = vpop.f32.mrf.mxu2 }
 0x150   : > { %v970_v47 = vadd.f32 %v1436_v20, %v934_v45  ;;  %v731_v48 = vadd.f32 %v730_v46, %v618_v44  ;;  %v843_v49 = vpop.f32.mrf.mxu3 }
 0x152   : > { %1002 = vst [vmem:[%s1443_s9 + $0x98] sm:$0xff] %v970_v47  ;;  %v844_v50 = vadd.f32 %v843_v49, %v731_v48  ;;  %v507_v51 = vpop.f32.mrf.mxu0 }
 0x153   : > { %v508_v52 = vadd.f32 %v1416_v0, %v507_v51 }
 0x154   : > { %v899_v53 = vmax.f32 %v844_v50, 0.0  ;;  %v620_v54 = vpop.f32.mrf.mxu1 }
 0x155   : > { %v621_v55 = vadd.f32 %v620_v54, %v508_v52 }
 0x156   : > { %v935_v56 = vmul.f32 %v1427_v14, %v899_v53 }
 0x157   : > { %v733_v57 = vpop.f32.mrf.mxu2 }
 0x158   : > { %v971_v58 = vadd.f32 %v1436_v20, %v935_v56  ;;  %v734_v59 = vadd.f32 %v733_v57, %v621_v55  ;;  %v846_v60 = vpop.f32.mrf.mxu3 }
 0x15a   : > { %1003 = vst [vmem:[%s1443_s9 + $0xa0] sm:$0xff] %v971_v58  ;;  %v847_v61 = vadd.f32 %v846_v60, %v734_v59  ;;  %v510_v62 = vpop.f32.mrf.mxu0 }
 0x15b   : > { %v511_v63 = vadd.f32 %v1416_v0, %v510_v62 }
 0x15c   : > { %v900_v1 = vmax.f32 %v847_v61, 0.0  ;;  %v623_v2 = vpop.f32.mrf.mxu1 }
 0x15d   : > { %v624_v3 = vadd.f32 %v623_v2, %v511_v63 }
 0x15e   : > { %v936_v4 = vmul.f32 %v1427_v14, %v900_v1 }
 0x15f   : > { %v736_v5 = vpop.f32.mrf.mxu2 }
 0x160   : > { %v972_v6 = vadd.f32 %v1436_v20, %v936_v4  ;;  %v737_v7 = vadd.f32 %v736_v5, %v624_v3  ;;  %v849_v8 = vpop.f32.mrf.mxu3 }
 0x162   : > { %1004 = vst [vmem:[%s1443_s9 + $0xa8] sm:$0xff] %v972_v6  ;;  %v850_v9 = vadd.f32 %v849_v8, %v737_v7  ;;  %v513_v10 = vpop.f32.mrf.mxu0 }
 0x163   : > { %v514_v11 = vadd.f32 %v1416_v0, %v513_v10 }
 0x164   : > { %v901_v12 = vmax.f32 %v850_v9, 0.0  ;;  %v626_v13 = vpop.f32.mrf.mxu1 }
 0x165   : > { %v627_v15 = vadd.f32 %v626_v13, %v514_v11 }
 0x166   : > { %v937_v16 = vmul.f32 %v1427_v14, %v901_v12 }
 0x167   : > { %v739_v17 = vpop.f32.mrf.mxu2 }
 0x168   : > { %v973_v18 = vadd.f32 %v1436_v20, %v937_v16  ;;  %v740_v19 = vadd.f32 %v739_v17, %v627_v15  ;;  %v852_v21 = vpop.f32.mrf.mxu3 }
 0x16a   : > { %1005 = vst [vmem:[%s1443_s9 + $0xb0] sm:$0xff] %v973_v18  ;;  %v853_v22 = vadd.f32 %v852_v21, %v740_v19  ;;  %v516_v23 = vpop.f32.mrf.mxu0 }
 0x16b   : > { %v517_v24 = vadd.f32 %v1416_v0, %v516_v23 }
 0x16c   : > { %v902_v25 = vmax.f32 %v853_v22, 0.0  ;;  %v629_v26 = vpop.f32.mrf.mxu1 }
 0x16d   : > { %v630_v27 = vadd.f32 %v629_v26, %v517_v24 }
 0x16e   : > { %v938_v28 = vmul.f32 %v1427_v14, %v902_v25 }
 0x16f   : > { %v742_v29 = vpop.f32.mrf.mxu2 }
 0x170   : > { %v974_v30 = vadd.f32 %v1436_v20, %v938_v28  ;;  %v743_v31 = vadd.f32 %v742_v29, %v630_v27  ;;  %v855_v32 = vpop.f32.mrf.mxu3 }
 0x172   : > { %1006 = vst [vmem:[%s1443_s9 + $0xb8] sm:$0xff] %v974_v30  ;;  %v856_v33 = vadd.f32 %v855_v32, %v743_v31  ;;  %v519_v34 = vpop.f32.mrf.mxu0 }
 0x173   : > { %v520_v35 = vadd.f32 %v1416_v0, %v519_v34 }
 0x174   : > { %v903_v36 = vmax.f32 %v856_v33, 0.0  ;;  %v632_v37 = vpop.f32.mrf.mxu1 }
 0x175   : > { %v633_v38 = vadd.f32 %v632_v37, %v520_v35 }
 0x176   : > { %v939_v39 = vmul.f32 %v1427_v14, %v903_v36 }
 0x177   : > { %v745_v40 = vpop.f32.mrf.mxu2 }
 0x178   : > { %v975_v41 = vadd.f32 %v1436_v20, %v939_v39  ;;  %v746_v42 = vadd.f32 %v745_v40, %v633_v38  ;;  %v858_v43 = vpop.f32.mrf.mxu3 }
 0x17a   : > { %1007 = vst [vmem:[%s1443_s9 + $0xc0] sm:$0xff] %v975_v41  ;;  %v859_v44 = vadd.f32 %v858_v43, %v746_v42  ;;  %v522_v45 = vpop.f32.mrf.mxu0 }
 0x17b   : > { %v523_v46 = vadd.f32 %v1416_v0, %v522_v45 }
 0x17c   : > { %v904_v47 = vmax.f32 %v859_v44, 0.0  ;;  %v635_v48 = vpop.f32.mrf.mxu1 }
 0x17d   : > { %v636_v49 = vadd.f32 %v635_v48, %v523_v46 }
 0x17e   : > { %v940_v50 = vmul.f32 %v1427_v14, %v904_v47 }
 0x17f   : > { %v748_v51 = vpop.f32.mrf.mxu2 }
 0x180   : > { %v976_v52 = vadd.f32 %v1436_v20, %v940_v50  ;;  %v749_v53 = vadd.f32 %v748_v51, %v636_v49  ;;  %v861_v54 = vpop.f32.mrf.mxu3 }
 0x182   : > { %1008 = vst [vmem:[%s1443_s9 + $0xc8] sm:$0xff] %v976_v52  ;;  %v862_v55 = vadd.f32 %v861_v54, %v749_v53  ;;  %v525_v56 = vpop.f32.mrf.mxu0 }
 0x183   : > { %v526_v57 = vadd.f32 %v1416_v0, %v525_v56 }
 0x184   : > { %v905_v58 = vmax.f32 %v862_v55, 0.0  ;;  %v638_v59 = vpop.f32.mrf.mxu1 }
 0x185   : > { %v639_v60 = vadd.f32 %v638_v59, %v526_v57 }
 0x186   : > { %v941_v61 = vmul.f32 %v1427_v14, %v905_v58 }
 0x187   : > { %v751_v62 = vpop.f32.mrf.mxu2 }
 0x188   : > { %v977_v63 = vadd.f32 %v1436_v20, %v941_v61  ;;  %v752_v1 = vadd.f32 %v751_v62, %v639_v60  ;;  %v864_v2 = vpop.f32.mrf.mxu3 }
 0x18a   : > { %1009 = vst [vmem:[%s1443_s9 + $0xd0] sm:$0xff] %v977_v63  ;;  %v865_v3 = vadd.f32 %v864_v2, %v752_v1  ;;  %v528_v4 = vpop.f32.mrf.mxu0 }
 0x18b   : > { %v529_v5 = vadd.f32 %v1416_v0, %v528_v4 }
 0x18c   : > { %v906_v6 = vmax.f32 %v865_v3, 0.0  ;;  %v641_v7 = vpop.f32.mrf.mxu1 }
 0x18d   : > { %v642_v8 = vadd.f32 %v641_v7, %v529_v5 }
 0x18e   : > { %v942_v9 = vmul.f32 %v1427_v14, %v906_v6 }
 0x18f   : > { %v754_v10 = vpop.f32.mrf.mxu2 }
 0x190   : > { %v978_v11 = vadd.f32 %v1436_v20, %v942_v9  ;;  %v755_v12 = vadd.f32 %v754_v10, %v642_v8  ;;  %v867_v13 = vpop.f32.mrf.mxu3 }
 0x192   : > { %1010 = vst [vmem:[%s1443_s9 + $0xd8] sm:$0xff] %v978_v11  ;;  %v868_v15 = vadd.f32 %v867_v13, %v755_v12  ;;  %v531_v16 = vpop.f32.mrf.mxu0 }
 0x193   : > { %v532_v17 = vadd.f32 %v1416_v0, %v531_v16 }
 0x194   : > { %v907_v18 = vmax.f32 %v868_v15, 0.0  ;;  %v644_v19 = vpop.f32.mrf.mxu1 }
 0x195   : > { %v645_v21 = vadd.f32 %v644_v19, %v532_v17 }
 0x196   : > { %v943_v22 = vmul.f32 %v1427_v14, %v907_v18 }
 0x197   : > { %v757_v23 = vpop.f32.mrf.mxu2 }
 0x198   : > { %v979_v24 = vadd.f32 %v1436_v20, %v943_v22  ;;  %v758_v25 = vadd.f32 %v757_v23, %v645_v21  ;;  %v870_v26 = vpop.f32.mrf.mxu3 }
 0x19a   : > { %1011 = vst [vmem:[%s1443_s9 + $0xe0] sm:$0xff] %v979_v24  ;;  %v871_v27 = vadd.f32 %v870_v26, %v758_v25  ;;  %v534_v28 = vpop.f32.mrf.mxu0 }
 0x19b   : > { %v535_v29 = vadd.f32 %v1416_v0, %v534_v28 }
 0x19c   : > { %v908_v30 = vmax.f32 %v871_v27, 0.0  ;;  %v647_v31 = vpop.f32.mrf.mxu1 }
 0x19d   : > { %v648_v32 = vadd.f32 %v647_v31, %v535_v29 }
 0x19e   : > { %v944_v33 = vmul.f32 %v1427_v14, %v908_v30 }
 0x19f   : > { %v760_v34 = vpop.f32.mrf.mxu2 }
 0x1a0   : > { %v980_v35 = vadd.f32 %v1436_v20, %v944_v33  ;;  %v761_v36 = vadd.f32 %v760_v34, %v648_v32  ;;  %v873_v37 = vpop.f32.mrf.mxu3 }
 0x1a2   : > { %1012 = vst [vmem:[%s1443_s9 + $0xe8] sm:$0xff] %v980_v35  ;;  %v874_v38 = vadd.f32 %v873_v37, %v761_v36  ;;  %v537_v39 = vpop.f32.mrf.mxu0 }
 0x1a3   : > { %v538_v40 = vadd.f32 %v1416_v0, %v537_v39 }
 0x1a4   : > { %v909_v41 = vmax.f32 %v874_v38, 0.0  ;;  %v650_v42 = vpop.f32.mrf.mxu1 }
 0x1a5   : > { %v651_v43 = vadd.f32 %v650_v42, %v538_v40 }
 0x1a6   : > { %v945_v44 = vmul.f32 %v1427_v14, %v909_v41 }
 0x1a7   : > { %v763_v45 = vpop.f32.mrf.mxu2 }
 0x1a8   : > { %v981_v46 = vadd.f32 %v1436_v20, %v945_v44  ;;  %v764_v47 = vadd.f32 %v763_v45, %v651_v43  ;;  %v876_v48 = vpop.f32.mrf.mxu3 }
 0x1aa   : > { %1013 = vst [vmem:[%s1443_s9 + $0xf0] sm:$0xff] %v981_v46  ;;  %v877_v49 = vadd.f32 %v876_v48, %v764_v47 }
 0x1ac   : > { %v910_v50 = vmax.f32 %v877_v49, 0.0 }
 0x1ae   : > { %v946_v51 = vmul.f32 %v1427_v14, %v910_v50 }
 0x1b0   : > { %v982_v52 = vadd.f32 %v1436_v20, %v946_v51 }
 0x1b2   : > { %1014 = vst [vmem:[%s1443_s9 + $0xf8] sm:$0xff] %v982_v52 }
 0x1b3 PF: > { %s15_s18 = sadd.s32 1, %s1101_s18  }
 0x1b4   : > { %p12_p4 = scmp.ge.s32.totalorder %s15_s18, 4  }
 0x1b6   :  { %14 = sbr.rel (!%p12_p4) target bundleno = 1 (0x1), region = 70 }

// kernel: encoder_forward.5
= control target key start
LH: loop header
LB: loop body
LE: loop exit
PB: predicated region body
PF: predicated region fallthrough
CT: control target
= control target key end

     0   :  { %s1005_s0 = inlined_call_operand.vmem [shape: f32[128,384], index: 0, kind: input, shape index: {}]   ;;  %s1006_s1 = inlined_call_operand.vmem [shape: f32[384,128], index: 1, kind: input, shape index: {}]   ;;  %s1007_s2 = inlined_call_operand.vmem [shape: f32[1,128], index: 2, kind: input, shape index: {}]   ;;  %s1008_s3 = inlined_call_operand.vmem [shape: f32[1,128], index: 3, kind: input, shape index: {}]   ;;  %s1009_s4 = inlined_call_operand.vmem [shape: f32[1,128], index: 4, kind: input, shape index: {}]   ;;  %s1010_s5 = inlined_call_operand.hbm [shape: f32[128,128], index: 5, kind: output, shape index: {}]  }
   0x1   :  { %v84_v0 = vld [vmem:[%s1006_s1 + $0x78] sm:$0xff]  ;;  %v83_v2 = vld [vmem:[%s1006_s1 + $0x70] sm:$0xff]  ;;  %v82_v5 = vld [vmem:[%s1006_s1 + $0x68] sm:$0xff] }
   0x2   :  { %v525_v1 = vld [vmem:[%s1006_s1 + $0x178] sm:$0xff]  ;;  %406 = vmatpush.msra.mxu3 %v84_v0  ;;  %v534_v3 = vld [vmem:[%s1006_s1 + $0x170] sm:$0xff]  ;;  %121 = vmatpush.msra.mxu0 %v84_v0  ;;  %v548_v6 = vld [vmem:[%s1006_s1 + $0x168] sm:$0xff] }
   0x3   :  { %251 = vmatpush.msra.mxu2 %v525_v1  ;;  %v539_v4 = vld [vmem:[%s1006_s1 + $0xf8] sm:$0xff]  ;;  %v553_v7 = vld [vmem:[%s1006_s1 + $0xf0] sm:$0xff]  ;;  %v559_v8 = vld [vmem:[%s1006_s1 + $0xe8] sm:$0xff] }
   0x4   :  { %186 = vmatpush.msra.mxu1 %v539_v4  ;;  %407 = vmatpush.msra.mxu3 %v83_v2  ;;  %v81_v9 = vld [vmem:[%s1006_s1 + $0x60] sm:$0xff]  ;;  %v80_v12 = vld [vmem:[%s1006_s1 + $0x58] sm:$0xff]  ;;  %v79_v15 = vld [vmem:[%s1006_s1 + $0x50] sm:$0xff] }
   0x5   :  { %252 = vmatpush.msra.mxu2 %v534_v3  ;;  %122 = vmatpush.msra.mxu0 %v83_v2  ;;  %v568_v10 = vld [vmem:[%s1006_s1 + $0x160] sm:$0xff]  ;;  %v583_v13 = vld [vmem:[%s1006_s1 + $0x158] sm:$0xff]  ;;  %v598_v16 = vld [vmem:[%s1006_s1 + $0x150] sm:$0xff] }
   0x6   :  { %187 = vmatpush.msra.mxu1 %v553_v7  ;;  %408 = vmatpush.msra.mxu3 %v82_v5  ;;  %v574_v11 = vld [vmem:[%s1006_s1 + $0xe0] sm:$0xff]  ;;  %v589_v14 = vld [vmem:[%s1006_s1 + $0xd8] sm:$0xff]  ;;  %v604_v17 = vld [vmem:[%s1006_s1 + $0xd0] sm:$0xff] }
   0x7   :  { %253 = vmatpush.msra.mxu2 %v548_v6  ;;  %123 = vmatpush.msra.mxu0 %v82_v5  ;;  %v78_v18 = vld [vmem:[%s1006_s1 + $0x48] sm:$0xff]  ;;  %v77_v21 = vld [vmem:[%s1006_s1 + $0x40] sm:$0xff]  ;;  %v76_v24 = vld [vmem:[%s1006_s1 + $0x38] sm:$0xff] }
   0x8   :  { %188 = vmatpush.msra.mxu1 %v559_v8  ;;  %409 = vmatpush.msra.mxu3 %v81_v9  ;;  %v613_v19 = vld [vmem:[%s1006_s1 + $0x148] sm:$0xff]  ;;  %v628_v22 = vld [vmem:[%s1006_s1 + $0x140] sm:$0xff]  ;;  %v643_v25 = vld [vmem:[%s1006_s1 + $0x138] sm:$0xff] }
   0x9   :  { %254 = vmatpush.msra.mxu2 %v568_v10  ;;  %124 = vmatpush.msra.mxu0 %v81_v9  ;;  %v619_v20 = vld [vmem:[%s1006_s1 + $0xc8] sm:$0xff]  ;;  %v634_v23 = vld [vmem:[%s1006_s1 + $0xc0] sm:$0xff]  ;;  %v649_v26 = vld [vmem:[%s1006_s1 + $0xb8] sm:$0xff] }
   0xa   :  { %189 = vmatpush.msra.mxu1 %v574_v11  ;;  %410 = vmatpush.msra.mxu3 %v80_v12  ;;  %v75_v27 = vld [vmem:[%s1006_s1 + $0x30] sm:$0xff]  ;;  %v74_v30 = vld [vmem:[%s1006_s1 + $0x28] sm:$0xff]  ;;  %v73_v32 = vld [vmem:[%s1006_s1 + $0x20] sm:$0xff] }
   0xb   :  { %255 = vmatpush.msra.mxu2 %v583_v13  ;;  %125 = vmatpush.msra.mxu0 %v80_v12  ;;  %v658_v28 = vld [vmem:[%s1006_s1 + $0x130] sm:$0xff]  ;;  %v673_v31 = vld [vmem:[%s1006_s1 + $0x128] sm:$0xff]  ;;  %v682_v33 = vld [vmem:[%s1006_s1 + $0x120] sm:$0xff] }
   0xc   :  { %190 = vmatpush.msra.mxu1 %v589_v14  ;;  %411 = vmatpush.msra.mxu3 %v79_v15  ;;  %v664_v29 = vld [vmem:[%s1006_s1 + $0xb0] sm:$0xff]  ;;  %v687_v34 = vld [vmem:[%s1006_s1 + $0xa8] sm:$0xff]  ;;  %v694_v35 = vld [vmem:[%s1006_s1 + $0xa0] sm:$0xff] }
   0xd   :  { %256 = vmatpush.msra.mxu2 %v598_v16  ;;  %126 = vmatpush.msra.mxu0 %v79_v15 }
   0xe   :  { %191 = vmatpush.msra.mxu1 %v604_v17  ;;  %412 = vmatpush.msra.mxu3 %v78_v18 }
   0xf   :  { %257 = vmatpush.msra.mxu2 %v613_v19  ;;  %127 = vmatpush.msra.mxu0 %v78_v18 }
  0x10   :  { %192 = vmatpush.msra.mxu1 %v619_v20  ;;  %413 = vmatpush.msra.mxu3 %v77_v21 }
  0x11   :  { %258 = vmatpush.msra.mxu2 %v628_v22  ;;  %128 = vmatpush.msra.mxu0 %v77_v21 }
  0x12   :  { %193 = vmatpush.msra.mxu1 %v634_v23  ;;  %414 = vmatpush.msra.mxu3 %v76_v24 }
  0x13   :  { %259 = vmatpush.msra.mxu2 %v643_v25  ;;  %129 = vmatpush.msra.mxu0 %v76_v24 }
  0x14   :  { %194 = vmatpush.msra.mxu1 %v649_v26  ;;  %415 = vmatpush.msra.mxu3 %v75_v27 }
  0x15   :  { %260 = vmatpush.msra.mxu2 %v658_v28  ;;  %130 = vmatpush.msra.mxu0 %v75_v27 }
  0x16   :  { %195 = vmatpush.msra.mxu1 %v664_v29  ;;  %416 = vmatpush.msra.mxu3 %v74_v30 }
  0x17   :  { %261 = vmatpush.msra.mxu2 %v673_v31 }
  0x18   :  { %10 = vsyncpa [#allocation3], 0  ;;  %131 = vmatpush.msra.mxu0 %v74_v30  ;;  %v72_v36 = vld [vmem:[%s1006_s1 + $0x18] sm:$0xff]  ;;  %196 = vmatpush.msra.mxu1 %v687_v34  ;;  %v71_v39 = vld [vmem:[%s1006_s1 + $0x10] sm:$0xff]  ;;  %s394_s12 = sshll.u32 %s1010_s5, 4  ;;  %s487_s13 = smov 128   ;;  %s395_s12 = int_to_ptr.hbm [resolvable:$true] %s394_s12 }
  0x19   :  { %v703_v37 = vld [vmem:[%s1006_s1 + $0x118] sm:$0xff]  ;;  %417 = vmatpush.msra.mxu3 %v73_v32  ;;  %262 = vmatpush.msra.mxu2 %v682_v33  ;;  %v718_v40 = vld [vmem:[%s1006_s1 + $0x110] sm:$0xff]  ;;  %v70_v42 = vld [vmem:[%s1006_s1 + $0x8] sm:$0xff]  ;;  %s488_s14 = smov 8  }
  0x1a   :  { %v709_v38 = vld [vmem:[%s1006_s1 + $0x98] sm:$0xff]  ;;  %132 = vmatpush.msra.mxu0 %v73_v32  ;;  %197 = vmatpush.msra.mxu1 %v694_v35  ;;  %v724_v41 = vld [vmem:[%s1006_s1 + $0x90] sm:$0xff]  ;;  %v733_v43 = vld [vmem:[%s1006_s1 + $0x108] sm:$0xff] }
  0x1b   :  { %418 = vmatpush.msra.mxu3 %v72_v36  ;;  %263 = vmatpush.msra.mxu2 %v703_v37  ;;  %v86_v44 = vld [vmem:[%s1006_s1 + $0x88] sm:$0xff]  ;;  %v69_v45 = vld [vmem:[%s1006_s1] sm:$0xff]  ;;  %v23_v48 = vld [vmem:[%s1005_s0 + $0x10] sm:$0xff] }
  0x1c   :  { %133 = vmatpush.msra.mxu0 %v72_v36  ;;  %198 = vmatpush.msra.mxu1 %v709_v38  ;;  %v746_v46 = vld [vmem:[%s1006_s1 + $0x100] sm:$0xff]  ;;  %v22_v51 = vld [vmem:[%s1005_s0 + $0x8] sm:$0xff]  ;;  %v60_v52 = vld [vmem:[%s1005_s0 + $0x138] sm:$0xff] }
  0x1d   :  { %419 = vmatpush.msra.mxu3 %v71_v39  ;;  %264 = vmatpush.msra.mxu2 %v718_v40  ;;  %v57_v47 = vld [vmem:[%s1005_s0 + $0x120] sm:$0xff]  ;;  %v26_v53 = vld [vmem:[%s1005_s0 + $0x28] sm:$0xff]  ;;  %v24_v54 = vld [vmem:[%s1005_s0 + $0x18] sm:$0xff] }
  0x1e   :  { %134 = vmatpush.msra.mxu0 %v71_v39  ;;  %199 = vmatpush.msra.mxu1 %v724_v41  ;;  %v21_v49 = vld [vmem:[%s1005_s0] sm:$0xff]  ;;  %v63_v56 = vld [vmem:[%s1005_s0 + $0x150] sm:$0xff]  ;;  %v28_v59 = vld [vmem:[%s1005_s0 + $0x38] sm:$0xff] }
  0x1f   :  { %420 = vmatpush.msra.mxu3 %v70_v42  ;;  %265 = vmatpush.msra.mxu2 %v733_v43  ;;  %v85_v50 = vld [vmem:[%s1006_s1 + $0x80] sm:$0xff]  ;;  %v27_v58 = vld [vmem:[%s1005_s0 + $0x30] sm:$0xff]  ;;  %v66_v60 = vld [vmem:[%s1005_s0 + $0x168] sm:$0xff] }
  0x20   :  { %135 = vmatpush.msra.mxu0 %v70_v42  ;;  %200 = vmatpush.msra.mxu1 %v86_v44  ;;  %v25_v55 = vld [vmem:[%s1005_s0 + $0x20] sm:$0xff]  ;;  %v32_v61 = vld [vmem:[%s1005_s0 + $0x58] sm:$0xff]  ;;  %v30_v62 = vld [vmem:[%s1005_s0 + $0x48] sm:$0xff] }
  0x21   :  { %421 = vmatpush.msra.mxu3 %v69_v45  ;;  %266 = vmatpush.msra.mxu2 %v746_v46  ;;  %v29_v57 = vld [vmem:[%s1005_s0 + $0x40] sm:$0xff]  ;;  %v31_v63 = vld [vmem:[%s1005_s0 + $0x50] sm:$0xff]  ;;  %v58_v0 = vld [vmem:[%s1005_s0 + $0x128] sm:$0xff] }
  0x22   :  { %173 = vmatmul.f32.vlgmr.msra.gmra.mxu3 %v57_v47  ;;  %267 = vmatmul.f32.vlgmr.msra.gmra.mxu2 %v23_v48  ;;  %v35_v2 = vld [vmem:[%s1005_s0 + $0x70] sm:$0xff]  ;;  %v34_v5 = vld [vmem:[%s1005_s0 + $0x68] sm:$0xff]  ;;  %v41_v9 = vld [vmem:[%s1005_s0 + $0xa0] sm:$0xff] }
  0x23   :  { %422 = vmatpush.msrb.mxu3 %v539_v4  ;;  %136 = vmatpush.msra.mxu0 %v69_v45  ;;  %v33_v4 = vld [vmem:[%s1005_s0 + $0x60] sm:$0xff]  ;;  %v67_v12 = vld [vmem:[%s1005_s0 + $0x170] sm:$0xff]  ;;  %v62_v21 = vld [vmem:[%s1005_s0 + $0x148] sm:$0xff] }
  0x24   :  { %137 = vmatmul.f32.vlgmr.msra.gmra.mxu0 %v21_v49  ;;  %201 = vmatpush.msra.mxu1 %v85_v50  ;;  %v43_v15 = vld [vmem:[%s1005_s0 + $0xb0] sm:$0xff]  ;;  %v45_v18 = vld [vmem:[%s1005_s0 + $0xc0] sm:$0xff]  ;;  %v52_v27 = vld [vmem:[%s1005_s0 + $0xf8] sm:$0xff] }
  0x25   :  { %423 = vmatpush.msrb.mxu3 %v553_v7  ;;  %202 = vmatmul.f32.vlgmr.msra.gmra.mxu1 %v22_v51  ;;  %v61_v7 = vld [vmem:[%s1005_s0 + $0x140] sm:$0xff]  ;;  %v54_v30 = vld [vmem:[%s1005_s0 + $0x108] sm:$0xff] }
  0x26   :  { %v53_v24 = vld [vmem:[%s1005_s0 + $0x100] sm:$0xff] }
  0x27   :  { %424 = vmatpush.msrb.mxu3 %v559_v8  ;;  %v38_v8 = vld [vmem:[%s1005_s0 + $0x88] sm:$0xff]  ;;  %v930_v32 = vld [vmem:[%s1007_s2] ss:$0 sm:$0xff]  ;;  %s486_s2 = smov [#allocation2]  }
  0x28   :  { %v943_v42 = vld [vmem:[%s1009_s4] ss:$0 sm:$0xff] }
  0x29   :  { %425 = vmatpush.msrb.mxu3 %v574_v11  ;;  %v40_v11 = vld [vmem:[%s1005_s0 + $0x98] sm:$0xff] }
  0x2a   :  { %176 = vmatmul.f32.gmra.mxu3 %v60_v52  ;;  %270 = vmatmul.f32.gmra.mxu2 %v26_v53 }
  0x2b   :  { %426 = vmatpush.msrb.mxu3 %v589_v14  ;;  %v42_v14 = vld [vmem:[%s1005_s0 + $0xa8] sm:$0xff] }
  0x2c   :  { %140 = vmatmul.f32.gmra.mxu0 %v24_v54 }
  0x2d   :  { %427 = vmatpush.msrb.mxu3 %v604_v17  ;;  %205 = vmatmul.f32.gmra.mxu1 %v25_v55  ;;  %v59_v17 = vld [vmem:[%s1005_s0 + $0x130] sm:$0xff] }
  0x2f   :  { %428 = vmatpush.msrb.mxu3 %v619_v20  ;;  %v50_v20 = vld [vmem:[%s1005_s0 + $0xe8] sm:$0xff] }
  0x31   :  { %429 = vmatpush.msrb.mxu3 %v634_v23  ;;  %v49_v23 = vld [vmem:[%s1005_s0 + $0xe0] sm:$0xff] }
  0x32   :  { %179 = vmatmul.f32.gmra.mxu3 %v63_v56  ;;  %273 = vmatmul.f32.gmra.mxu2 %v29_v57 }
  0x33   :  { %430 = vmatpush.msrb.mxu3 %v649_v26  ;;  %v51_v26 = vld [vmem:[%s1005_s0 + $0xf0] sm:$0xff] }
  0x34   :  { %143 = vmatmul.f32.gmra.mxu0 %v27_v58 }
  0x35   :  { %431 = vmatpush.msrb.mxu3 %v664_v29  ;;  %208 = vmatmul.f32.gmra.mxu1 %v28_v59  ;;  %v68_v29 = vld [vmem:[%s1005_s0 + $0x178] sm:$0xff] }
  0x37   :  { %432 = vmatpush.msrb.mxu3 %v687_v34 }
  0x39   :  { %433 = vmatpush.msrb.mxu3 %v694_v35 }
  0x3a   :  { %182 = vmatmul.f32.gmra.mxu3 %v66_v60  ;;  %276 = vmatmul.f32.gmra.mxu2 %v32_v61 }
  0x3b   :  { %434 = vmatpush.msrb.mxu3 %v709_v38 }
  0x3c   :  { %146 = vmatmul.f32.gmra.mxu0 %v30_v62 }
  0x3d   :  { %435 = vmatpush.msrb.mxu3 %v724_v41  ;;  %211 = vmatmul.f32.gmra.mxu1 %v31_v63 }
  0x3f   :  { %436 = vmatpush.msrb.mxu3 %v86_v44 }
  0x41   :  { %437 = vmatpush.msrb.mxu3 %v85_v50 }
  0x42   :  { %238 = vmatmul.f32.vlgmr.msrb.gmra.mxu3 %v58_v0  ;;  %279 = vmatmul.f32.gmra.mxu2 %v35_v2 }
  0x43   :  { %438 = vmatpush.msra.mxu3 %v525_v1  ;;  %v36_v1 = vld [vmem:[%s1005_s0 + $0x78] sm:$0xff] }
  0x44   :  { %149 = vmatmul.f32.gmra.mxu0 %v33_v4 }
  0x45   :  { %439 = vmatpush.msra.mxu3 %v534_v3  ;;  %214 = vmatmul.f32.gmra.mxu1 %v34_v5  ;;  %v37_v3 = vld [vmem:[%s1005_s0 + $0x80] sm:$0xff] }
  0x47   :  { %440 = vmatpush.msra.mxu3 %v548_v6  ;;  %v64_v6 = vld [vmem:[%s1005_s0 + $0x158] sm:$0xff] }
  0x49   :  { %441 = vmatpush.msra.mxu3 %v568_v10  ;;  %v39_v10 = vld [vmem:[%s1005_s0 + $0x90] sm:$0xff] }
  0x4a   :  { %241 = vmatmul.f32.gmra.mxu3 %v61_v7  ;;  %282 = vmatmul.f32.gmra.mxu2 %v38_v8 }
  0x4b   :  { %442 = vmatpush.msra.mxu3 %v583_v13  ;;  %v44_v13 = vld [vmem:[%s1005_s0 + $0xb8] sm:$0xff] }
  0x4c   :  { %152 = vmatmul.f32.gmra.mxu0 %v36_v1 }
  0x4d   :  { %443 = vmatpush.msra.mxu3 %v598_v16  ;;  %217 = vmatmul.f32.gmra.mxu1 %v37_v3  ;;  %v47_v16 = vld [vmem:[%s1005_s0 + $0xd0] sm:$0xff] }
  0x4f   :  { %444 = vmatpush.msra.mxu3 %v613_v19  ;;  %v46_v19 = vld [vmem:[%s1005_s0 + $0xc8] sm:$0xff] }
  0x51   :  { %445 = vmatpush.msra.mxu3 %v628_v22  ;;  %v48_v22 = vld [vmem:[%s1005_s0 + $0xd8] sm:$0xff] }
  0x52   :  { %244 = vmatmul.f32.gmra.mxu3 %v64_v6  ;;  %285 = vmatmul.f32.gmra.mxu2 %v41_v9 }
  0x53   :  { %446 = vmatpush.msra.mxu3 %v643_v25  ;;  %v65_v25 = vld [vmem:[%s1005_s0 + $0x160] sm:$0xff] }
  0x54   :  { %155 = vmatmul.f32.gmra.mxu0 %v39_v10 }
  0x55   :  { %447 = vmatpush.msra.mxu3 %v658_v28  ;;  %220 = vmatmul.f32.gmra.mxu1 %v40_v11  ;;  %v56_v28 = vld [vmem:[%s1005_s0 + $0x118] sm:$0xff] }
  0x57   :  { %448 = vmatpush.msra.mxu3 %v673_v31  ;;  %v55_v31 = vld [vmem:[%s1005_s0 + $0x110] sm:$0xff] }
  0x59   :  { %449 = vmatpush.msra.mxu3 %v682_v33 }
  0x5a   :  { %247 = vmatmul.f32.gmra.mxu3 %v67_v12  ;;  %288 = vmatmul.f32.gmra.mxu2 %v44_v13 }
  0x5b   :  { %450 = vmatpush.msra.mxu3 %v703_v37 }
  0x5c   :  { %158 = vmatmul.f32.gmra.mxu0 %v42_v14 }
  0x5d   :  { %451 = vmatpush.msra.mxu3 %v718_v40  ;;  %223 = vmatmul.f32.gmra.mxu1 %v43_v15  ;;  %v938_v40 = vld [vmem:[%s1008_s3] ss:$0 sm:$0xff]  ;;  %s392_s3 = sshll.u32 %s486_s2, 4  ;;  %s393_s3 = int_to_ptr.vmem [resolvable:$true] %s392_s3 }
  0x5f   :  { %452 = vmatpush.msra.mxu3 %v733_v43 }
  0x61   :  { %453 = vmatpush.msra.mxu3 %v746_v46 }
  0x62   :  { %291 = vmatmul.f32.gmra.mxu2 %v47_v16  ;;  %303 = vmatmul.f32.vlgmr.msra.gmra.mxu3 %v59_v17 }
  0x64   :  { %161 = vmatmul.f32.gmra.mxu0 %v45_v18 }
  0x65   :  { %226 = vmatmul.f32.gmra.mxu1 %v46_v19 }
  0x6a   :  { %294 = vmatmul.f32.gmra.mxu2 %v50_v20  ;;  %306 = vmatmul.f32.gmra.mxu3 %v62_v21 }
  0x6c   :  { %164 = vmatmul.f32.gmra.mxu0 %v48_v22 }
  0x6d   :  { %229 = vmatmul.f32.gmra.mxu1 %v49_v23 }
  0x72   :  { %297 = vmatmul.f32.gmra.mxu2 %v53_v24  ;;  %309 = vmatmul.f32.gmra.mxu3 %v65_v25 }
  0x74   :  { %167 = vmatmul.f32.gmra.mxu0 %v51_v26 }
  0x75   :  { %232 = vmatmul.f32.gmra.mxu1 %v52_v27 }
  0x7a   :  { %300 = vmatmul.f32.gmra.mxu2 %v56_v28  ;;  %312 = vmatmul.f32.gmra.mxu3 %v68_v29 }
  0x7c   :  { %170 = vmatmul.f32.gmra.mxu0 %v54_v30 }
  0x7d   :  { %235 = vmatmul.f32.gmra.mxu1 %v55_v31 }
  0xa1   :  { %v138_v33 = vpop.f32.mrf.mxu0 }
  0xa2   :  { %v139_v34 = vadd.f32 %v930_v32, %v138_v33  ;;  %v203_v35 = vpop.f32.mrf.mxu1 }
  0xa4   :  { %v204_v36 = vadd.f32 %v203_v35, %v139_v34 }
  0xa5   :  { %v933_v37 = vpop.f32.mrf.mxu3  ;;  %v268_v38 = vpop.f32.mrf.mxu2 }
  0xa6   :  { %v269_v39 = vadd.f32 %v268_v38, %v204_v36 }
  0xa8   :  { %v316_v41 = vmax.f32 %v269_v39, 0.0 }
  0xa9   :  { %v141_v43 = vpop.f32.mrf.mxu0 }
  0xaa   :  { %v336_v44 = vmul.f32 %v938_v40, %v316_v41  ;;  %v142_v45 = vadd.f32 %v930_v32, %v141_v43  ;;  %v206_v46 = vpop.f32.mrf.mxu1 }
  0xac   :  { %v356_v47 = vadd.f32 %v943_v42, %v336_v44  ;;  %v207_v48 = vadd.f32 %v206_v46, %v142_v45 }
  0xad   :  { %v948_v49 = vpop.f32.mrf.mxu3  ;;  %v271_v50 = vpop.f32.mrf.mxu2 }
  0xae   :  { %372 = vst [vmem:[#allocation2] sm:$0xff] %v356_v47  ;;  %v272_v51 = vadd.f32 %v271_v50, %v207_v48 }
  0xb0   :  { %v317_v52 = vmax.f32 %v272_v51, 0.0 }
  0xb1   :  { %v144_v53 = vpop.f32.mrf.mxu0 }
  0xb2   :  { %v337_v54 = vmul.f32 %v938_v40, %v317_v52  ;;  %v145_v55 = vadd.f32 %v930_v32, %v144_v53  ;;  %v209_v56 = vpop.f32.mrf.mxu1 }
  0xb4   :  { %v357_v57 = vadd.f32 %v943_v42, %v337_v54  ;;  %v210_v58 = vadd.f32 %v209_v56, %v145_v55  ;;  %v175_v55 = vadd.f32 %v930_v32, %v933_v37  ;;  %v178_v37 = vadd.f32 %v930_v32, %v948_v49 }
  0xb5   :  { %v953_v59 = vpop.f32.mrf.mxu3  ;;  %v274_v60 = vpop.f32.mrf.mxu2 }
  0xb6   :  { %373 = vst [vmem:[#allocation2 + $0x8] sm:$0xff] %v357_v57  ;;  %v275_v61 = vadd.f32 %v274_v60, %v210_v58 }
  0xb8   :  { %v318_v62 = vmax.f32 %v275_v61, 0.0 }
  0xb9   :  { %v147_v63 = vpop.f32.mrf.mxu0 }
  0xba   :  { %v338_v0 = vmul.f32 %v938_v40, %v318_v62  ;;  %v148_v2 = vadd.f32 %v930_v32, %v147_v63  ;;  %v212_v4 = vpop.f32.mrf.mxu1 }
  0xbc   :  { %v358_v5 = vadd.f32 %v943_v42, %v338_v0  ;;  %v213_v7 = vadd.f32 %v212_v4, %v148_v2 }
  0xbd   :  { %v958_v8 = vpop.f32.mrf.mxu3  ;;  %v277_v1 = vpop.f32.mrf.mxu2 }
  0xbe   :  { %374 = vst [vmem:[#allocation2 + $0x10] sm:$0xff] %v358_v5  ;;  %v278_v3 = vadd.f32 %v277_v1, %v213_v7 }
  0xc0   :  { %v319_v6 = vmax.f32 %v278_v3, 0.0 }
  0xc1   :  { %v150_v9 = vpop.f32.mrf.mxu0 }
  0xc2   :  { %v339_v10 = vmul.f32 %v938_v40, %v319_v6  ;;  %v151_v11 = vadd.f32 %v930_v32, %v150_v9  ;;  %v215_v12 = vpop.f32.mrf.mxu1 }
  0xc4   :  { %v359_v13 = vadd.f32 %v943_v42, %v339_v10  ;;  %v216_v14 = vadd.f32 %v215_v12, %v151_v11 }
  0xc5   :  { %v239_v15 = vpop.f32.mrf.mxu3  ;;  %v280_v16 = vpop.f32.mrf.mxu2 }
  0xc6   :  { %375 = vst [vmem:[#allocation2 + $0x18] sm:$0xff] %v359_v13  ;;  %v281_v17 = vadd.f32 %v280_v16, %v216_v14  ;;  %v240_v60 = vadd.f32 %v239_v15, %v175_v55 }
  0xc8   :  { %v320_v18 = vmax.f32 %v281_v17, 0.0 }
  0xc9   :  { %v153_v19 = vpop.f32.mrf.mxu0 }
  0xca   :  { %v340_v20 = vmul.f32 %v938_v40, %v320_v18  ;;  %v154_v21 = vadd.f32 %v930_v32, %v153_v19  ;;  %v218_v22 = vpop.f32.mrf.mxu1 }
  0xcc   :  { %v360_v23 = vadd.f32 %v943_v42, %v340_v20  ;;  %v219_v24 = vadd.f32 %v218_v22, %v154_v21  ;;  %v181_v21 = vadd.f32 %v930_v32, %v953_v59 }
  0xcd   :  { %v242_v25 = vpop.f32.mrf.mxu3  ;;  %v283_v26 = vpop.f32.mrf.mxu2 }
  0xce   :  { %376 = vst [vmem:[#allocation2 + $0x20] sm:$0xff] %v360_v23  ;;  %v284_v27 = vadd.f32 %v283_v26, %v219_v24  ;;  %v243_v11 = vadd.f32 %v242_v25, %v178_v37 }
  0xd0   :  { %v321_v28 = vmax.f32 %v284_v27, 0.0 }
  0xd1   :  { %v156_v29 = vpop.f32.mrf.mxu0 }
  0xd2   :  { %v341_v30 = vmul.f32 %v938_v40, %v321_v28  ;;  %v157_v31 = vadd.f32 %v930_v32, %v156_v29  ;;  %v221_v33 = vpop.f32.mrf.mxu1 }
  0xd4   :  { %v361_v34 = vadd.f32 %v943_v42, %v341_v30  ;;  %v222_v35 = vadd.f32 %v221_v33, %v157_v31 }
  0xd5   :  { %v245_v36 = vpop.f32.mrf.mxu3  ;;  %v286_v38 = vpop.f32.mrf.mxu2 }
  0xd6   :  { %377 = vst [vmem:[#allocation2 + $0x28] sm:$0xff] %v361_v34  ;;  %v287_v39 = vadd.f32 %v286_v38, %v222_v35  ;;  %v246_v26 = vadd.f32 %v245_v36, %v181_v21 }
  0xd8   :  { %v322_v41 = vmax.f32 %v287_v39, 0.0  ;;  %v184_v39 = vadd.f32 %v930_v32, %v958_v8 }
  0xd9   :  { %v159_v43 = vpop.f32.mrf.mxu0 }
  0xda   :  { %v342_v44 = vmul.f32 %v938_v40, %v322_v41  ;;  %v160_v45 = vadd.f32 %v930_v32, %v159_v43  ;;  %v224_v46 = vpop.f32.mrf.mxu1 }
  0xdc   :  { %v362_v47 = vadd.f32 %v943_v42, %v342_v44  ;;  %v225_v48 = vadd.f32 %v224_v46, %v160_v45 }
  0xdd   :  { %v248_v50 = vpop.f32.mrf.mxu3  ;;  %v289_v51 = vpop.f32.mrf.mxu2 }
  0xde   :  { %378 = vst [vmem:[#allocation2 + $0x30] sm:$0xff] %v362_v47  ;;  %v290_v52 = vadd.f32 %v289_v51, %v225_v48  ;;  %v249_v45 = vadd.f32 %v248_v50, %v184_v39 }
  0xe0   :  { %v323_v53 = vmax.f32 %v290_v52, 0.0 }
  0xe1   :  { %v162_v54 = vpop.f32.mrf.mxu0 }
  0xe2   :  { %v343_v56 = vmul.f32 %v938_v40, %v323_v53  ;;  %v163_v57 = vadd.f32 %v930_v32, %v162_v54  ;;  %v227_v58 = vpop.f32.mrf.mxu1 }
  0xe4   :  { %v363_v61 = vadd.f32 %v943_v42, %v343_v56  ;;  %v228_v62 = vadd.f32 %v227_v58, %v163_v57 }
  0xe5   :  { %v292_v63 = vpop.f32.mrf.mxu2  ;;  %v304_v0 = vpop.f32.mrf.mxu3 }
  0xe6   :  { %379 = vst [vmem:[#allocation2 + $0x38] sm:$0xff] %v363_v61  ;;  %v293_v2 = vadd.f32 %v292_v63, %v228_v62  ;;  %v305_v4 = vadd.f32 %v304_v0, %v240_v60 }
  0xe8   :  { %v324_v5 = vmax.f32 %v293_v2, 0.0  ;;  %v328_v7 = vmax.f32 %v305_v4, 0.0 }
  0xe9   :  { %v165_v1 = vpop.f32.mrf.mxu0 }
  0xea   :  { %v344_v3 = vmul.f32 %v938_v40, %v324_v5  ;;  %v348_v6 = vmul.f32 %v938_v40, %v328_v7  ;;  %v166_v9 = vadd.f32 %v930_v32, %v165_v1  ;;  %v230_v10 = vpop.f32.mrf.mxu1 }
  0xec   :  { %v364_v12 = vadd.f32 %v943_v42, %v344_v3  ;;  %v368_v13 = vadd.f32 %v943_v42, %v348_v6  ;;  %v231_v14 = vadd.f32 %v230_v10, %v166_v9 }
  0xed   :  { %v295_v15 = vpop.f32.mrf.mxu2  ;;  %v307_v16 = vpop.f32.mrf.mxu3 }
  0xee   :  { %380 = vst [vmem:[#allocation2 + $0x40] sm:$0xff] %v364_v12  ;;  %v296_v17 = vadd.f32 %v295_v15, %v231_v14  ;;  %v308_v18 = vadd.f32 %v307_v16, %v243_v11 }
  0xef   :  { %384 = vst [vmem:[#allocation2 + $0x60] sm:$0xff] %v368_v13 }
  0xf0   :  { %v325_v49 = vmax.f32 %v296_v17, 0.0  ;;  %v329_v19 = vmax.f32 %v308_v18, 0.0 }
  0xf1   :  { %v168_v20 = vpop.f32.mrf.mxu0 }
  0xf2   :  { %v345_v22 = vmul.f32 %v938_v40, %v325_v49  ;;  %v349_v23 = vmul.f32 %v938_v40, %v329_v19  ;;  %v169_v24 = vadd.f32 %v930_v32, %v168_v20  ;;  %v233_v25 = vpop.f32.mrf.mxu1 }
  0xf4   :  { %v365_v27 = vadd.f32 %v943_v42, %v345_v22  ;;  %v369_v28 = vadd.f32 %v943_v42, %v349_v23  ;;  %v234_v29 = vadd.f32 %v233_v25, %v169_v24 }
  0xf5   :  { %v298_v30 = vpop.f32.mrf.mxu2  ;;  %v310_v31 = vpop.f32.mrf.mxu3 }
  0xf6   :  { %381 = vst [vmem:[#allocation2 + $0x48] sm:$0xff] %v365_v27  ;;  %v299_v33 = vadd.f32 %v298_v30, %v234_v29  ;;  %v311_v34 = vadd.f32 %v310_v31, %v246_v26 }
  0xf7   :  { %385 = vst [vmem:[#allocation2 + $0x68] sm:$0xff] %v369_v28 }
  0xf8   :  { %v326_v59 = vmax.f32 %v299_v33, 0.0  ;;  %v330_v35 = vmax.f32 %v311_v34, 0.0 }
  0xf9   :  { %v171_v38 = vpop.f32.mrf.mxu0 }
  0xfa   :  { %v346_v41 = vmul.f32 %v938_v40, %v326_v59  ;;  %v350_v36 = vmul.f32 %v938_v40, %v330_v35  ;;  %v172_v43 = vadd.f32 %v930_v32, %v171_v38  ;;  %v236_v44 = vpop.f32.mrf.mxu1 }
  0xfc   :  { %v366_v46 = vadd.f32 %v943_v42, %v346_v41  ;;  %v370_v47 = vadd.f32 %v943_v42, %v350_v36  ;;  %v237_v48 = vadd.f32 %v236_v44, %v172_v43 }
  0xfd   :  { %v301_v51 = vpop.f32.mrf.mxu2  ;;  %v313_v52 = vpop.f32.mrf.mxu3 }
  0xfe   :  { %382 = vst [vmem:[#allocation2 + $0x50] sm:$0xff] %v366_v46  ;;  %v302_v53 = vadd.f32 %v301_v51, %v237_v48  ;;  %v314_v54 = vadd.f32 %v313_v52, %v249_v45 }
  0xff   :  { %386 = vst [vmem:[#allocation2 + $0x70] sm:$0xff] %v370_v47 }
 0x100   :  { %v327_v8 = vmax.f32 %v302_v53, 0.0  ;;  %v331_v55 = vmax.f32 %v314_v54, 0.0 }
 0x102   :  { %v347_v32 = vmul.f32 %v938_v40, %v327_v8  ;;  %v351_v50 = vmul.f32 %v938_v40, %v331_v55 }
 0x104   :  { %v367_v56 = vadd.f32 %v943_v42, %v347_v32  ;;  %v371_v57 = vadd.f32 %v943_v42, %v351_v50 }
 0x106   :  { %383 = vst [vmem:[#allocation2 + $0x58] sm:$0xff] %v367_v56 }
 0x107   :  { %387 = vst [vmem:[#allocation2 + $0x78] sm:$0xff] %v371_v57 }
 0x108   :  { %400 = dma.vmem_to_hbm [thread:$0]  %s393_s3, 2048, %s395_s12, [#allocation3], %s487_s13, %s487_s13, %s488_s14  }
 0x109   :  { %484 = dma.done.wait [#allocation3], 2048  }
 0x10a   :  { %485 = vsyncadd [#allocation3], 4294965248 }
 0x10b   :  { %405 = vsyncpa [#allocation3], 1 }

</bundles_post_ra>
